<compile_context>
chip_gen: v5e
topology: v5e:2x2
jax: 0.10.0
libtpu: 0.0.40
codegen_flags: <defaults>
</compile_context>

<pallas_src>
import jax
import jax.numpy as jnp
from jax import lax
from jax.experimental import pallas as pl
from jax.experimental.pallas import tpu as pltpu


def _gelu_exact(z):
    # Exact (erf-based) GELU matching torch.nn.GELU() default.
    # erf via Abramowitz & Stegun 7.1.26 (|abs err| < 1.5e-7): exp lands in the EUP slot.
    u = z * 0.7071067811865476
    a = jnp.abs(u)
    t = 1.0 / (1.0 + 0.3275911 * a)
    poly = ((((1.061405429 * t - 1.453152027) * t + 1.421413741) * t
             - 0.284496736) * t + 0.254829592) * t
    e = 1.0 - poly * jnp.exp(-a * a)
    erf_u = jnp.where(u >= 0.0, e, -e)
    return 0.5 * z * (1.0 + erf_u)


def res2mlp_forward(x, params):
    N, C, H, W = x.shape
    HW = H * W
    qc = C // 4
    half = C // 2
    eps = 1e-5

    # ---------------- in-kernel building blocks (whole-slab ops) ----------------
    def conv1x1(slab, w, b):
        # out[o, p] = sum_c w[o, c] * slab[c, p] + b[o]
        # C broadcast-column MACs on the full (C, HW) slab (VPU only, MXU stays idle).
        acc = w[:, 0:1] * slab[0:1, :]
        for c in range(1, C):
            acc = acc + w[:, c:c + 1] * slab[c:c + 1, :]
        return acc + b

    def layernorm(slab, w, b):
        # LayerNorm over [C, H, W] per sample; single pass (sum & sum-of-squares).
        inv_n = 1.0 / float(C * HW)
        s = jnp.sum(jnp.sum(slab, axis=1, keepdims=True), axis=0, keepdims=True)
        ss = jnp.sum(jnp.sum(slab * slab, axis=1, keepdims=True), axis=0, keepdims=True)
        mean = s * inv_n
        var = ss * inv_n - mean * mean
        inv = lax.rsqrt(var + eps)
        return (slab - mean) * (inv * w) + b

    def spatial_shift(slab):
        # Replicate-padded SpatialShift2d on the flattened (C, H*W) slab:
        # lane rolls (XLU slot) + boundary fix-up selects (VPU slot).
        pos = lax.broadcasted_iota(jnp.int32, (C, HW), 1)
        if (W & (W - 1)) == 0:
            w_idx = jnp.bitwise_and(pos, W - 1)
        else:
            w_idx = pos % W
        # left : out[h,w] = in[h, max(w-1, 0)]
        left = jnp.where(w_idx == 0, slab, pltpu.roll(slab, shift=1, axis=1))
        # right: out[h,w] = in[h, min(w+1, W-1)]
        right = jnp.where(w_idx == W - 1, slab, pltpu.roll(slab, shift=HW - 1, axis=1))
        # up   : out[h,w] = in[max(h-1, 0), w]
        up = jnp.where(pos < W, slab, pltpu.roll(slab, shift=W, axis=1))
        # down : out[h,w] = in[min(h+1, H-1), w]
        down = jnp.where(pos >= HW - W, slab, pltpu.roll(slab, shift=HW - W, axis=1))
        return jnp.concatenate(
            [left[:qc], right[qc:2 * qc], up[2 * qc:3 * qc], down[3 * qc:]], axis=0)

    def kernel(x_ref, cw_ref, cb_ref, lnw_ref, lnb_ref, out_ref):
        xs = x_ref[0]                                   # (C, HW) packed slab
        # repeat_interleave(x, 2, dim=1) then chunk(2, dim=1), done in-register:
        #   x1 row c = x row c//2 ; x2 row c = x row C//2 + c//2
        x1 = jnp.concatenate([xs[c // 2:c // 2 + 1] for c in range(C)], axis=0)
        x2 = jnp.concatenate(
            [xs[half + c // 2:half + c // 2 + 1] for c in range(C)], axis=0)

        # F branch: conv -> gelu -> spatial shift -> conv -> LayerNorm
        f = conv1x1(x2, cw_ref[0], cb_ref[0])
        f = _gelu_exact(f)
        f = spatial_shift(f)
        f = conv1x1(f, cw_ref[1], cb_ref[1])
        f = layernorm(f, lnw_ref[0], lnb_ref[0])
        y1 = x1 + f

        # G branch: conv -> gelu -> conv -> LayerNorm
        g = conv1x1(y1, cw_ref[2], cb_ref[2])
        g = _gelu_exact(g)
        g = conv1x1(g, cw_ref[3], cb_ref[3])
        g = layernorm(g, lnw_ref[1], lnb_ref[1])
        y2 = x2 + g

        # final chunk + mean of halves: one lane-dense full-block store
        out_ref[0] = (y1 + y2) * 0.5

    # ---- pack parameters into a few VMEM-resident arrays (tiny, one-time) ----
    conv_w = jnp.stack([params["wf1"], params["wf2"], params["wg1"], params["wg2"]])
    conv_b = jnp.stack([params["bf1"], params["bf2"], params["bg1"],
                        params["bg2"]])[:, :, None]
    ln_w = jnp.stack([params["lnfw"], params["lngw"]]).reshape(2, C, HW)
    ln_b = jnp.stack([params["lnfb"], params["lngb"]]).reshape(2, C, HW)
    x_flat = x.reshape(N, C, HW)                        # free reshape, no copy

    out_flat = pl.pallas_call(
        kernel,
        out_shape=jax.ShapeDtypeStruct((N, C, HW), jnp.float32),
        grid=(N,),
        in_specs=[
            pl.BlockSpec((1, C, HW), lambda n: (n, 0, 0)),
            pl.BlockSpec((4, C, C), lambda n: (0, 0, 0)),
            pl.BlockSpec((4, C, 1), lambda n: (0, 0, 0)),
            pl.BlockSpec((2, C, HW), lambda n: (0, 0, 0)),
            pl.BlockSpec((2, C, HW), lambda n: (0, 0, 0)),
        ],
        out_specs=pl.BlockSpec((1, C, HW), lambda n: (n, 0, 0)),
        compiler_params=pltpu.CompilerParams(dimension_semantics=("parallel",)),
    )(x_flat, conv_w, conv_b, ln_w, ln_b)
    return out_flat.reshape(N, C, H, W)


# ---------------- pure-JAX reference (for validation) ----------------
def ref_forward(x, params):
    N, C, H, W = x.shape
    qc = C // 4
    xr = jnp.repeat(x, 2, axis=1)
    x1, x2 = xr[:, :C], xr[:, C:]

    def conv(z, w, b):
        return jnp.einsum('oc,nchw->nohw', w, z) + b[None, :, None, None]

    def gelu(z):
        return 0.5 * z * (1.0 + jax.scipy.special.erf(z / jnp.sqrt(2.0)))

    def ln(z, w, b):
        m = jnp.mean(z, axis=(1, 2, 3), keepdims=True)
        v = jnp.mean((z - m) ** 2, axis=(1, 2, 3), keepdims=True)
        return (z - m) / jnp.sqrt(v + 1e-5) * w[None] + b[None]

    def shift(z):
        l, r, u, d = z[:, :qc], z[:, qc:2 * qc], z[:, 2 * qc:3 * qc], z[:, 3 * qc:]
        l = jnp.concatenate([l[..., :, :1], l[..., :, :-1]], axis=-1)
        r = jnp.concatenate([r[..., :, 1:], r[..., :, -1:]], axis=-1)
        u = jnp.concatenate([u[..., :1, :], u[..., :-1, :]], axis=-2)
        d = jnp.concatenate([d[..., 1:, :], d[..., -1:, :]], axis=-2)
        return jnp.concatenate([l, r, u, d], axis=1)

    f = conv(x2, params["wf1"], params["bf1"])
    f = gelu(f)
    f = shift(f)
    f = conv(f, params["wf2"], params["bf2"])
    f = ln(f, params["lnfw"], params["lnfb"])
    y1 = x1 + f
    g = conv(y1, params["wg1"], params["bg1"])
    g = gelu(g)
    g = conv(g, params["wg2"], params["bg2"])
    g = ln(g, params["lngw"], params["lngb"])
    y2 = x2 + g
    return (y1 + y2) * 0.5


if __name__ == "__main__":
    N, C, H, W = 2, 4, 16, 16          # channels=4, image_size=[16, 16]
    key = jax.random.PRNGKey(0)
    ks = jax.random.split(key, 13)

    def wmat(k):
        return jax.random.normal(k, (C, C), jnp.float32) / jnp.sqrt(float(C))

    def bvec(k):
        return 0.1 * jax.random.normal(k, (C,), jnp.float32)

    params = {
        "wf1": wmat(ks[0]), "bf1": bvec(ks[1]),
        "wf2": wmat(ks[2]), "bf2": bvec(ks[3]),
        "lnfw": 1.0 + 0.1 * jax.random.normal(ks[4], (C, H, W), jnp.float32),
        "lnfb": 0.1 * jax.random.normal(ks[5], (C, H, W), jnp.float32),
        "wg1": wmat(ks[6]), "bg1": bvec(ks[7]),
        "wg2": wmat(ks[8]), "bg2": bvec(ks[9]),
        "lngw": 1.0 + 0.1 * jax.random.normal(ks[10], (C, H, W), jnp.float32),
        "lngb": 0.1 * jax.random.normal(ks[11], (C, H, W), jnp.float32),
    }
    x = jax.random.normal(ks[12], (N, C, H, W), jnp.float32)

    out = res2mlp_forward(x, params)
    out = jax.block_until_ready(out)

    ref = ref_forward(x, params)
    err = float(jnp.max(jnp.abs(out - ref)))
    assert out.shape == (N, C, H, W)
    assert err < 1e-3, f"max abs err too large: {err}"
    print("KERNEL_OK")
</pallas_src>

<mosaic_0001>
module attributes {stable_mosaic.version = 11 : i64} {
  func.func @kernel(%arg0: i32, %arg1: memref<1x4x256xf32, #tpu.memory_space<vmem>>, %arg2: memref<4x4x4xf32, #tpu.memory_space<vmem>>, %arg3: memref<4x4x1xf32, #tpu.memory_space<vmem>>, %arg4: memref<2x4x256xf32, #tpu.memory_space<vmem>>, %arg5: memref<2x4x256xf32, #tpu.memory_space<vmem>>, %arg6: memref<1x4x256xf32, #tpu.memory_space<vmem>>) attributes {dimension_semantics = [#tpu.dimension_semantics<parallel>], iteration_bounds = array<i64: 2>, scalar_prefetch = 0 : i64, scratch_operands = 0 : i64, tpu.core_type = #tpu.core_type<tc>, window_params = [{transform_indices = @transform_0, window_bounds = array<i64: 1, 4, 256>}, {pipeline_mode = #tpu.pipeline_mode<synchronous>, transform_indices = @transform_1, window_bounds = array<i64: 4, 4, 4>}, {pipeline_mode = #tpu.pipeline_mode<synchronous>, transform_indices = @transform_2, window_bounds = array<i64: 4, 4, 1>}, {pipeline_mode = #tpu.pipeline_mode<synchronous>, transform_indices = @transform_3, window_bounds = array<i64: 2, 4, 256>}, {pipeline_mode = #tpu.pipeline_mode<synchronous>, transform_indices = @transform_4, window_bounds = array<i64: 2, 4, 256>}, {transform_indices = @transform_5, window_bounds = array<i64: 1, 4, 256>}]} {
    %c0 = arith.constant 0 : index
    %c0_0 = arith.constant 0 : index
    %c0_1 = arith.constant 0 : index
    %0 = vector.load %arg1[%c0, %c0_0, %c0_1] : memref<1x4x256xf32, #tpu.memory_space<vmem>>, vector<1x4x256xf32>
    %1 = vector.shape_cast %0 : vector<1x4x256xf32> to vector<4x256xf32>
    %2 = vector.extract_strided_slice %1 {offsets = [0, 0], sizes = [1, 256], strides = [1, 1]} : vector<4x256xf32> to vector<1x256xf32>
    %3 = vector.extract_strided_slice %1 {offsets = [0, 0], sizes = [1, 256], strides = [1, 1]} : vector<4x256xf32> to vector<1x256xf32>
    %4 = vector.extract_strided_slice %1 {offsets = [1, 0], sizes = [1, 256], strides = [1, 1]} : vector<4x256xf32> to vector<1x256xf32>
    %5 = vector.extract_strided_slice %1 {offsets = [1, 0], sizes = [1, 256], strides = [1, 1]} : vector<4x256xf32> to vector<1x256xf32>
    %6 = tpu.concatenate %2, %3, %4, %5 in 0 : vector<1x256xf32>, vector<1x256xf32>, vector<1x256xf32>, vector<1x256xf32> -> vector<4x256xf32>
    %7 = vector.extract_strided_slice %1 {offsets = [2, 0], sizes = [1, 256], strides = [1, 1]} : vector<4x256xf32> to vector<1x256xf32>
    %8 = vector.extract_strided_slice %1 {offsets = [2, 0], sizes = [1, 256], strides = [1, 1]} : vector<4x256xf32> to vector<1x256xf32>
    %9 = vector.extract_strided_slice %1 {offsets = [3, 0], sizes = [1, 256], strides = [1, 1]} : vector<4x256xf32> to vector<1x256xf32>
    %10 = vector.extract_strided_slice %1 {offsets = [3, 0], sizes = [1, 256], strides = [1, 1]} : vector<4x256xf32> to vector<1x256xf32>
    %11 = tpu.concatenate %7, %8, %9, %10 in 0 : vector<1x256xf32>, vector<1x256xf32>, vector<1x256xf32>, vector<1x256xf32> -> vector<4x256xf32>
    %c0_2 = arith.constant 0 : index
    %c0_3 = arith.constant 0 : index
    %c0_4 = arith.constant 0 : index
    %12 = vector.load %arg2[%c0_2, %c0_3, %c0_4] : memref<4x4x4xf32, #tpu.memory_space<vmem>>, vector<1x4x4xf32>
    %13 = vector.shape_cast %12 : vector<1x4x4xf32> to vector<4x4xf32>
    %c0_5 = arith.constant 0 : index
    %c0_6 = arith.constant 0 : index
    %c0_7 = arith.constant 0 : index
    %14 = vector.load %arg3[%c0_5, %c0_6, %c0_7] : memref<4x4x1xf32, #tpu.memory_space<vmem>>, vector<1x4x1xf32>
    %15 = vector.shape_cast %14 : vector<1x4x1xf32> to vector<4x1xf32>
    %16 = vector.extract_strided_slice %13 {offsets = [0, 0], sizes = [4, 1], strides = [1, 1]} : vector<4x4xf32> to vector<4x1xf32>
    %17 = vector.extract_strided_slice %11 {offsets = [0, 0], sizes = [1, 256], strides = [1, 1]} : vector<4x256xf32> to vector<1x256xf32>
    %18 = vector.broadcast %16 : vector<4x1xf32> to vector<4x256xf32>
    %19 = vector.broadcast %17 : vector<1x256xf32> to vector<4x256xf32>
    %20 = arith.mulf %18, %19 : vector<4x256xf32>
    %21 = vector.extract_strided_slice %13 {offsets = [0, 1], sizes = [4, 1], strides = [1, 1]} : vector<4x4xf32> to vector<4x1xf32>
    %22 = vector.extract_strided_slice %11 {offsets = [1, 0], sizes = [1, 256], strides = [1, 1]} : vector<4x256xf32> to vector<1x256xf32>
    %23 = vector.broadcast %21 : vector<4x1xf32> to vector<4x256xf32>
    %24 = vector.broadcast %22 : vector<1x256xf32> to vector<4x256xf32>
    %25 = arith.mulf %23, %24 : vector<4x256xf32>
    %26 = arith.addf %20, %25 : vector<4x256xf32>
    %27 = vector.extract_strided_slice %13 {offsets = [0, 2], sizes = [4, 1], strides = [1, 1]} : vector<4x4xf32> to vector<4x1xf32>
    %28 = vector.extract_strided_slice %11 {offsets = [2, 0], sizes = [1, 256], strides = [1, 1]} : vector<4x256xf32> to vector<1x256xf32>
    %29 = vector.broadcast %27 : vector<4x1xf32> to vector<4x256xf32>
    %30 = vector.broadcast %28 : vector<1x256xf32> to vector<4x256xf32>
    %31 = arith.mulf %29, %30 : vector<4x256xf32>
    %32 = arith.addf %26, %31 : vector<4x256xf32>
    %33 = vector.extract_strided_slice %13 {offsets = [0, 3], sizes = [4, 1], strides = [1, 1]} : vector<4x4xf32> to vector<4x1xf32>
    %34 = vector.extract_strided_slice %11 {offsets = [3, 0], sizes = [1, 256], strides = [1, 1]} : vector<4x256xf32> to vector<1x256xf32>
    %35 = vector.broadcast %33 : vector<4x1xf32> to vector<4x256xf32>
    %36 = vector.broadcast %34 : vector<1x256xf32> to vector<4x256xf32>
    %37 = arith.mulf %35, %36 : vector<4x256xf32>
    %38 = arith.addf %32, %37 : vector<4x256xf32>
    %39 = vector.broadcast %15 : vector<4x1xf32> to vector<4x256xf32>
    %40 = arith.addf %38, %39 : vector<4x256xf32>
    %cst = arith.constant 0.707106769 : f32
    %41 = vector.broadcast %cst : f32 to vector<4x256xf32>
    %42 = arith.mulf %40, %41 : vector<4x256xf32>
    %43 = math.absf %42 : vector<4x256xf32>
    %cst_8 = arith.constant 0.327591091 : f32
    %44 = vector.broadcast %cst_8 : f32 to vector<4x256xf32>
    %45 = arith.mulf %44, %43 : vector<4x256xf32>
    %cst_9 = arith.constant 1.000000e+00 : f32
    %46 = vector.broadcast %cst_9 : f32 to vector<4x256xf32>
    %47 = arith.addf %46, %45 : vector<4x256xf32>
    %cst_10 = arith.constant 1.000000e+00 : f32
    %48 = vector.broadcast %cst_10 : f32 to vector<4x256xf32>
    %49 = arith.divf %48, %47 : vector<4x256xf32>
    %cst_11 = arith.constant 1.06140542 : f32
    %50 = vector.broadcast %cst_11 : f32 to vector<4x256xf32>
    %51 = arith.mulf %50, %49 : vector<4x256xf32>
    %cst_12 = arith.constant 1.45315206 : f32
    %52 = vector.broadcast %cst_12 : f32 to vector<4x256xf32>
    %53 = arith.subf %51, %52 : vector<4x256xf32>
    %54 = arith.mulf %53, %49 : vector<4x256xf32>
    %cst_13 = arith.constant 1.42141378 : f32
    %55 = vector.broadcast %cst_13 : f32 to vector<4x256xf32>
    %56 = arith.addf %54, %55 : vector<4x256xf32>
    %57 = arith.mulf %56, %49 : vector<4x256xf32>
    %cst_14 = arith.constant 0.284496725 : f32
    %58 = vector.broadcast %cst_14 : f32 to vector<4x256xf32>
    %59 = arith.subf %57, %58 : vector<4x256xf32>
    %60 = arith.mulf %59, %49 : vector<4x256xf32>
    %cst_15 = arith.constant 0.254829586 : f32
    %61 = vector.broadcast %cst_15 : f32 to vector<4x256xf32>
    %62 = arith.addf %60, %61 : vector<4x256xf32>
    %63 = arith.mulf %62, %49 : vector<4x256xf32>
    %cst_16 = arith.constant 0.000000e+00 : f32
    %64 = vector.broadcast %cst_16 : f32 to vector<4x256xf32>
    %65 = arith.subf %64, %43 : vector<4x256xf32>
    %66 = arith.mulf %65, %43 : vector<4x256xf32>
    %67 = math.exp %66 : vector<4x256xf32>
    %68 = arith.mulf %63, %67 : vector<4x256xf32>
    %cst_17 = arith.constant 1.000000e+00 : f32
    %69 = vector.broadcast %cst_17 : f32 to vector<4x256xf32>
    %70 = arith.subf %69, %68 : vector<4x256xf32>
    %cst_18 = arith.constant 0.000000e+00 : f32
    %71 = vector.broadcast %cst_18 : f32 to vector<4x256xf32>
    %72 = arith.cmpf oge, %42, %71 : vector<4x256xf32>
    %cst_19 = arith.constant 0.000000e+00 : f32
    %73 = vector.broadcast %cst_19 : f32 to vector<4x256xf32>
    %74 = arith.subf %73, %70 : vector<4x256xf32>
    %75 = arith.select %72, %70, %74 : vector<4x256xi1>, vector<4x256xf32>
    %cst_20 = arith.constant 5.000000e-01 : f32
    %76 = vector.broadcast %cst_20 : f32 to vector<4x256xf32>
    %77 = arith.mulf %76, %40 : vector<4x256xf32>
    %cst_21 = arith.constant 1.000000e+00 : f32
    %78 = vector.broadcast %cst_21 : f32 to vector<4x256xf32>
    %79 = arith.addf %78, %75 : vector<4x256xf32>
    %80 = arith.mulf %77, %79 : vector<4x256xf32>
    %81 = tpu.iota {dimensions = array<i32: 1>} : vector<4x256xi32>
    %c15_i32 = arith.constant 15 : i32
    %82 = vector.broadcast %c15_i32 : i32 to vector<4x256xi32>
    %83 = arith.andi %81, %82 : vector<4x256xi32>
    %c0_i32 = arith.constant 0 : i32
    %84 = vector.broadcast %c0_i32 : i32 to vector<4x256xi32>
    %85 = arith.cmpi eq, %83, %84 : vector<4x256xi32>
    %c1_i32 = arith.constant 1 : i32
    %86 = tpu.dynamic_rotate %80 by %c1_i32 dim 1 : vector<4x256xf32>, i32 -> vector<4x256xf32>
    %87 = arith.select %85, %80, %86 : vector<4x256xi1>, vector<4x256xf32>
    %c15_i32_22 = arith.constant 15 : i32
    %88 = vector.broadcast %c15_i32_22 : i32 to vector<4x256xi32>
    %89 = arith.cmpi eq, %83, %88 : vector<4x256xi32>
    %c255_i32 = arith.constant 255 : i32
    %90 = tpu.dynamic_rotate %80 by %c255_i32 dim 1 : vector<4x256xf32>, i32 -> vector<4x256xf32>
    %91 = arith.select %89, %80, %90 : vector<4x256xi1>, vector<4x256xf32>
    %c16_i32 = arith.constant 16 : i32
    %92 = vector.broadcast %c16_i32 : i32 to vector<4x256xi32>
    %93 = arith.cmpi slt, %81, %92 : vector<4x256xi32>
    %c16_i32_23 = arith.constant 16 : i32
    %94 = tpu.dynamic_rotate %80 by %c16_i32_23 dim 1 : vector<4x256xf32>, i32 -> vector<4x256xf32>
    %95 = arith.select %93, %80, %94 : vector<4x256xi1>, vector<4x256xf32>
    %c240_i32 = arith.constant 240 : i32
    %96 = vector.broadcast %c240_i32 : i32 to vector<4x256xi32>
    %97 = arith.cmpi sge, %81, %96 : vector<4x256xi32>
    %c240_i32_24 = arith.constant 240 : i32
    %98 = tpu.dynamic_rotate %80 by %c240_i32_24 dim 1 : vector<4x256xf32>, i32 -> vector<4x256xf32>
    %99 = arith.select %97, %80, %98 : vector<4x256xi1>, vector<4x256xf32>
    %100 = vector.extract_strided_slice %87 {offsets = [0, 0], sizes = [1, 256], strides = [1, 1]} : vector<4x256xf32> to vector<1x256xf32>
    %101 = vector.extract_strided_slice %91 {offsets = [1, 0], sizes = [1, 256], strides = [1, 1]} : vector<4x256xf32> to vector<1x256xf32>
    %102 = vector.extract_strided_slice %95 {offsets = [2, 0], sizes = [1, 256], strides = [1, 1]} : vector<4x256xf32> to vector<1x256xf32>
    %103 = vector.extract_strided_slice %99 {offsets = [3, 0], sizes = [1, 256], strides = [1, 1]} : vector<4x256xf32> to vector<1x256xf32>
    %104 = tpu.concatenate %100, %101, %102, %103 in 0 : vector<1x256xf32>, vector<1x256xf32>, vector<1x256xf32>, vector<1x256xf32> -> vector<4x256xf32>
    %c1 = arith.constant 1 : index
    %c0_25 = arith.constant 0 : index
    %c0_26 = arith.constant 0 : index
    %105 = vector.load %arg2[%c1, %c0_25, %c0_26] : memref<4x4x4xf32, #tpu.memory_space<vmem>>, vector<1x4x4xf32>
    %106 = vector.shape_cast %105 : vector<1x4x4xf32> to vector<4x4xf32>
    %c1_27 = arith.constant 1 : index
    %c0_28 = arith.constant 0 : index
    %c0_29 = arith.constant 0 : index
    %107 = vector.load %arg3[%c1_27, %c0_28, %c0_29] : memref<4x4x1xf32, #tpu.memory_space<vmem>>, vector<1x4x1xf32>
    %108 = vector.shape_cast %107 : vector<1x4x1xf32> to vector<4x1xf32>
    %109 = vector.extract_strided_slice %106 {offsets = [0, 0], sizes = [4, 1], strides = [1, 1]} : vector<4x4xf32> to vector<4x1xf32>
    %110 = vector.extract_strided_slice %104 {offsets = [0, 0], sizes = [1, 256], strides = [1, 1]} : vector<4x256xf32> to vector<1x256xf32>
    %111 = vector.broadcast %109 : vector<4x1xf32> to vector<4x256xf32>
    %112 = vector.broadcast %110 : vector<1x256xf32> to vector<4x256xf32>
    %113 = arith.mulf %111, %112 : vector<4x256xf32>
    %114 = vector.extract_strided_slice %106 {offsets = [0, 1], sizes = [4, 1], strides = [1, 1]} : vector<4x4xf32> to vector<4x1xf32>
    %115 = vector.extract_strided_slice %104 {offsets = [1, 0], sizes = [1, 256], strides = [1, 1]} : vector<4x256xf32> to vector<1x256xf32>
    %116 = vector.broadcast %114 : vector<4x1xf32> to vector<4x256xf32>
    %117 = vector.broadcast %115 : vector<1x256xf32> to vector<4x256xf32>
    %118 = arith.mulf %116, %117 : vector<4x256xf32>
    %119 = arith.addf %113, %118 : vector<4x256xf32>
    %120 = vector.extract_strided_slice %106 {offsets = [0, 2], sizes = [4, 1], strides = [1, 1]} : vector<4x4xf32> to vector<4x1xf32>
    %121 = vector.extract_strided_slice %104 {offsets = [2, 0], sizes = [1, 256], strides = [1, 1]} : vector<4x256xf32> to vector<1x256xf32>
    %122 = vector.broadcast %120 : vector<4x1xf32> to vector<4x256xf32>
    %123 = vector.broadcast %121 : vector<1x256xf32> to vector<4x256xf32>
    %124 = arith.mulf %122, %123 : vector<4x256xf32>
    %125 = arith.addf %119, %124 : vector<4x256xf32>
    %126 = vector.extract_strided_slice %106 {offsets = [0, 3], sizes = [4, 1], strides = [1, 1]} : vector<4x4xf32> to vector<4x1xf32>
    %127 = vector.extract_strided_slice %104 {offsets = [3, 0], sizes = [1, 256], strides = [1, 1]} : vector<4x256xf32> to vector<1x256xf32>
    %128 = vector.broadcast %126 : vector<4x1xf32> to vector<4x256xf32>
    %129 = vector.broadcast %127 : vector<1x256xf32> to vector<4x256xf32>
    %130 = arith.mulf %128, %129 : vector<4x256xf32>
    %131 = arith.addf %125, %130 : vector<4x256xf32>
    %132 = vector.broadcast %108 : vector<4x1xf32> to vector<4x256xf32>
    %133 = arith.addf %131, %132 : vector<4x256xf32>
    %c0_30 = arith.constant 0 : index
    %c0_31 = arith.constant 0 : index
    %c0_32 = arith.constant 0 : index
    %134 = vector.load %arg4[%c0_30, %c0_31, %c0_32] : memref<2x4x256xf32, #tpu.memory_space<vmem>>, vector<1x4x256xf32>
    %135 = vector.shape_cast %134 : vector<1x4x256xf32> to vector<4x256xf32>
    %c0_33 = arith.constant 0 : index
    %c0_34 = arith.constant 0 : index
    %c0_35 = arith.constant 0 : index
    %136 = vector.load %arg5[%c0_33, %c0_34, %c0_35] : memref<2x4x256xf32, #tpu.memory_space<vmem>>, vector<1x4x256xf32>
    %137 = vector.shape_cast %136 : vector<1x4x256xf32> to vector<4x256xf32>
    %cst_36 = arith.constant dense<0.000000e+00> : vector<4xf32>
    %138 = vector.multi_reduction <add>, %133, %cst_36 [1] : vector<4x256xf32> to vector<4xf32>
    %139 = vector.shape_cast %138 : vector<4xf32> to vector<4x1xf32>
    %cst_37 = arith.constant dense<0.000000e+00> : vector<1xf32>
    %140 = vector.multi_reduction <add>, %139, %cst_37 [0] : vector<4x1xf32> to vector<1xf32>
    %141 = vector.shape_cast %140 : vector<1xf32> to vector<1x1xf32>
    %142 = arith.mulf %133, %133 : vector<4x256xf32>
    %cst_38 = arith.constant dense<0.000000e+00> : vector<4xf32>
    %143 = vector.multi_reduction <add>, %142, %cst_38 [1] : vector<4x256xf32> to vector<4xf32>
    %144 = vector.shape_cast %143 : vector<4xf32> to vector<4x1xf32>
    %cst_39 = arith.constant dense<0.000000e+00> : vector<1xf32>
    %145 = vector.multi_reduction <add>, %144, %cst_39 [0] : vector<4x1xf32> to vector<1xf32>
    %146 = vector.shape_cast %145 : vector<1xf32> to vector<1x1xf32>
    %cst_40 = arith.constant 9.765625E-4 : f32
    %147 = vector.broadcast %cst_40 : f32 to vector<1x1xf32>
    %148 = arith.mulf %141, %147 : vector<1x1xf32>
    %cst_41 = arith.constant 9.765625E-4 : f32
    %149 = vector.broadcast %cst_41 : f32 to vector<1x1xf32>
    %150 = arith.mulf %146, %149 : vector<1x1xf32>
    %151 = arith.mulf %148, %148 : vector<1x1xf32>
    %152 = arith.subf %150, %151 : vector<1x1xf32>
    %cst_42 = arith.constant 9.99999974E-6 : f32
    %153 = vector.broadcast %cst_42 : f32 to vector<1x1xf32>
    %154 = arith.addf %152, %153 : vector<1x1xf32>
    %155 = math.rsqrt %154 : vector<1x1xf32>
    %156 = vector.broadcast %148 : vector<1x1xf32> to vector<4x256xf32>
    %157 = arith.subf %133, %156 : vector<4x256xf32>
    %158 = vector.broadcast %155 : vector<1x1xf32> to vector<4x256xf32>
    %159 = arith.mulf %158, %135 : vector<4x256xf32>
    %160 = arith.mulf %157, %159 : vector<4x256xf32>
    %161 = arith.addf %160, %137 : vector<4x256xf32>
    %162 = arith.addf %6, %161 : vector<4x256xf32>
    %c2 = arith.constant 2 : index
    %c0_43 = arith.constant 0 : index
    %c0_44 = arith.constant 0 : index
    %163 = vector.load %arg2[%c2, %c0_43, %c0_44] : memref<4x4x4xf32, #tpu.memory_space<vmem>>, vector<1x4x4xf32>
    %164 = vector.shape_cast %163 : vector<1x4x4xf32> to vector<4x4xf32>
    %c2_45 = arith.constant 2 : index
    %c0_46 = arith.constant 0 : index
    %c0_47 = arith.constant 0 : index
    %165 = vector.load %arg3[%c2_45, %c0_46, %c0_47] : memref<4x4x1xf32, #tpu.memory_space<vmem>>, vector<1x4x1xf32>
    %166 = vector.shape_cast %165 : vector<1x4x1xf32> to vector<4x1xf32>
    %167 = vector.extract_strided_slice %164 {offsets = [0, 0], sizes = [4, 1], strides = [1, 1]} : vector<4x4xf32> to vector<4x1xf32>
    %168 = vector.extract_strided_slice %162 {offsets = [0, 0], sizes = [1, 256], strides = [1, 1]} : vector<4x256xf32> to vector<1x256xf32>
    %169 = vector.broadcast %167 : vector<4x1xf32> to vector<4x256xf32>
    %170 = vector.broadcast %168 : vector<1x256xf32> to vector<4x256xf32>
    %171 = arith.mulf %169, %170 : vector<4x256xf32>
    %172 = vector.extract_strided_slice %164 {offsets = [0, 1], sizes = [4, 1], strides = [1, 1]} : vector<4x4xf32> to vector<4x1xf32>
    %173 = vector.extract_strided_slice %162 {offsets = [1, 0], sizes = [1, 256], strides = [1, 1]} : vector<4x256xf32> to vector<1x256xf32>
    %174 = vector.broadcast %172 : vector<4x1xf32> to vector<4x256xf32>
    %175 = vector.broadcast %173 : vector<1x256xf32> to vector<4x256xf32>
    %176 = arith.mulf %174, %175 : vector<4x256xf32>
    %177 = arith.addf %171, %176 : vector<4x256xf32>
    %178 = vector.extract_strided_slice %164 {offsets = [0, 2], sizes = [4, 1], strides = [1, 1]} : vector<4x4xf32> to vector<4x1xf32>
    %179 = vector.extract_strided_slice %162 {offsets = [2, 0], sizes = [1, 256], strides = [1, 1]} : vector<4x256xf32> to vector<1x256xf32>
    %180 = vector.broadcast %178 : vector<4x1xf32> to vector<4x256xf32>
    %181 = vector.broadcast %179 : vector<1x256xf32> to vector<4x256xf32>
    %182 = arith.mulf %180, %181 : vector<4x256xf32>
    %183 = arith.addf %177, %182 : vector<4x256xf32>
    %184 = vector.extract_strided_slice %164 {offsets = [0, 3], sizes = [4, 1], strides = [1, 1]} : vector<4x4xf32> to vector<4x1xf32>
    %185 = vector.extract_strided_slice %162 {offsets = [3, 0], sizes = [1, 256], strides = [1, 1]} : vector<4x256xf32> to vector<1x256xf32>
    %186 = vector.broadcast %184 : vector<4x1xf32> to vector<4x256xf32>
    %187 = vector.broadcast %185 : vector<1x256xf32> to vector<4x256xf32>
    %188 = arith.mulf %186, %187 : vector<4x256xf32>
    %189 = arith.addf %183, %188 : vector<4x256xf32>
    %190 = vector.broadcast %166 : vector<4x1xf32> to vector<4x256xf32>
    %191 = arith.addf %189, %190 : vector<4x256xf32>
    %cst_48 = arith.constant 0.707106769 : f32
    %192 = vector.broadcast %cst_48 : f32 to vector<4x256xf32>
    %193 = arith.mulf %191, %192 : vector<4x256xf32>
    %194 = math.absf %193 : vector<4x256xf32>
    %cst_49 = arith.constant 0.327591091 : f32
    %195 = vector.broadcast %cst_49 : f32 to vector<4x256xf32>
    %196 = arith.mulf %195, %194 : vector<4x256xf32>
    %cst_50 = arith.constant 1.000000e+00 : f32
    %197 = vector.broadcast %cst_50 : f32 to vector<4x256xf32>
    %198 = arith.addf %197, %196 : vector<4x256xf32>
    %cst_51 = arith.constant 1.000000e+00 : f32
    %199 = vector.broadcast %cst_51 : f32 to vector<4x256xf32>
    %200 = arith.divf %199, %198 : vector<4x256xf32>
    %cst_52 = arith.constant 1.06140542 : f32
    %201 = vector.broadcast %cst_52 : f32 to vector<4x256xf32>
    %202 = arith.mulf %201, %200 : vector<4x256xf32>
    %cst_53 = arith.constant 1.45315206 : f32
    %203 = vector.broadcast %cst_53 : f32 to vector<4x256xf32>
    %204 = arith.subf %202, %203 : vector<4x256xf32>
    %205 = arith.mulf %204, %200 : vector<4x256xf32>
    %cst_54 = arith.constant 1.42141378 : f32
    %206 = vector.broadcast %cst_54 : f32 to vector<4x256xf32>
    %207 = arith.addf %205, %206 : vector<4x256xf32>
    %208 = arith.mulf %207, %200 : vector<4x256xf32>
    %cst_55 = arith.constant 0.284496725 : f32
    %209 = vector.broadcast %cst_55 : f32 to vector<4x256xf32>
    %210 = arith.subf %208, %209 : vector<4x256xf32>
    %211 = arith.mulf %210, %200 : vector<4x256xf32>
    %cst_56 = arith.constant 0.254829586 : f32
    %212 = vector.broadcast %cst_56 : f32 to vector<4x256xf32>
    %213 = arith.addf %211, %212 : vector<4x256xf32>
    %214 = arith.mulf %213, %200 : vector<4x256xf32>
    %cst_57 = arith.constant 0.000000e+00 : f32
    %215 = vector.broadcast %cst_57 : f32 to vector<4x256xf32>
    %216 = arith.subf %215, %194 : vector<4x256xf32>
    %217 = arith.mulf %216, %194 : vector<4x256xf32>
    %218 = math.exp %217 : vector<4x256xf32>
    %219 = arith.mulf %214, %218 : vector<4x256xf32>
    %cst_58 = arith.constant 1.000000e+00 : f32
    %220 = vector.broadcast %cst_58 : f32 to vector<4x256xf32>
    %221 = arith.subf %220, %219 : vector<4x256xf32>
    %cst_59 = arith.constant 0.000000e+00 : f32
    %222 = vector.broadcast %cst_59 : f32 to vector<4x256xf32>
    %223 = arith.cmpf oge, %193, %222 : vector<4x256xf32>
    %cst_60 = arith.constant 0.000000e+00 : f32
    %224 = vector.broadcast %cst_60 : f32 to vector<4x256xf32>
    %225 = arith.subf %224, %221 : vector<4x256xf32>
    %226 = arith.select %223, %221, %225 : vector<4x256xi1>, vector<4x256xf32>
    %cst_61 = arith.constant 5.000000e-01 : f32
    %227 = vector.broadcast %cst_61 : f32 to vector<4x256xf32>
    %228 = arith.mulf %227, %191 : vector<4x256xf32>
    %cst_62 = arith.constant 1.000000e+00 : f32
    %229 = vector.broadcast %cst_62 : f32 to vector<4x256xf32>
    %230 = arith.addf %229, %226 : vector<4x256xf32>
    %231 = arith.mulf %228, %230 : vector<4x256xf32>
    %c3 = arith.constant 3 : index
    %c0_63 = arith.constant 0 : index
    %c0_64 = arith.constant 0 : index
    %232 = vector.load %arg2[%c3, %c0_63, %c0_64] : memref<4x4x4xf32, #tpu.memory_space<vmem>>, vector<1x4x4xf32>
    %233 = vector.shape_cast %232 : vector<1x4x4xf32> to vector<4x4xf32>
    %c3_65 = arith.constant 3 : index
    %c0_66 = arith.constant 0 : index
    %c0_67 = arith.constant 0 : index
    %234 = vector.load %arg3[%c3_65, %c0_66, %c0_67] : memref<4x4x1xf32, #tpu.memory_space<vmem>>, vector<1x4x1xf32>
    %235 = vector.shape_cast %234 : vector<1x4x1xf32> to vector<4x1xf32>
    %236 = vector.extract_strided_slice %233 {offsets = [0, 0], sizes = [4, 1], strides = [1, 1]} : vector<4x4xf32> to vector<4x1xf32>
    %237 = vector.extract_strided_slice %231 {offsets = [0, 0], sizes = [1, 256], strides = [1, 1]} : vector<4x256xf32> to vector<1x256xf32>
    %238 = vector.broadcast %236 : vector<4x1xf32> to vector<4x256xf32>
    %239 = vector.broadcast %237 : vector<1x256xf32> to vector<4x256xf32>
    %240 = arith.mulf %238, %239 : vector<4x256xf32>
    %241 = vector.extract_strided_slice %233 {offsets = [0, 1], sizes = [4, 1], strides = [1, 1]} : vector<4x4xf32> to vector<4x1xf32>
    %242 = vector.extract_strided_slice %231 {offsets = [1, 0], sizes = [1, 256], strides = [1, 1]} : vector<4x256xf32> to vector<1x256xf32>
    %243 = vector.broadcast %241 : vector<4x1xf32> to vector<4x256xf32>
    %244 = vector.broadcast %242 : vector<1x256xf32> to vector<4x256xf32>
    %245 = arith.mulf %243, %244 : vector<4x256xf32>
    %246 = arith.addf %240, %245 : vector<4x256xf32>
    %247 = vector.extract_strided_slice %233 {offsets = [0, 2], sizes = [4, 1], strides = [1, 1]} : vector<4x4xf32> to vector<4x1xf32>
    %248 = vector.extract_strided_slice %231 {offsets = [2, 0], sizes = [1, 256], strides = [1, 1]} : vector<4x256xf32> to vector<1x256xf32>
    %249 = vector.broadcast %247 : vector<4x1xf32> to vector<4x256xf32>
    %250 = vector.broadcast %248 : vector<1x256xf32> to vector<4x256xf32>
    %251 = arith.mulf %249, %250 : vector<4x256xf32>
    %252 = arith.addf %246, %251 : vector<4x256xf32>
    %253 = vector.extract_strided_slice %233 {offsets = [0, 3], sizes = [4, 1], strides = [1, 1]} : vector<4x4xf32> to vector<4x1xf32>
    %254 = vector.extract_strided_slice %231 {offsets = [3, 0], sizes = [1, 256], strides = [1, 1]} : vector<4x256xf32> to vector<1x256xf32>
    %255 = vector.broadcast %253 : vector<4x1xf32> to vector<4x256xf32>
    %256 = vector.broadcast %254 : vector<1x256xf32> to vector<4x256xf32>
    %257 = arith.mulf %255, %256 : vector<4x256xf32>
    %258 = arith.addf %252, %257 : vector<4x256xf32>
    %259 = vector.broadcast %235 : vector<4x1xf32> to vector<4x256xf32>
    %260 = arith.addf %258, %259 : vector<4x256xf32>
    %c1_68 = arith.constant 1 : index
    %c0_69 = arith.constant 0 : index
    %c0_70 = arith.constant 0 : index
    %261 = vector.load %arg4[%c1_68, %c0_69, %c0_70] : memref<2x4x256xf32, #tpu.memory_space<vmem>>, vector<1x4x256xf32>
    %262 = vector.shape_cast %261 : vector<1x4x256xf32> to vector<4x256xf32>
    %c1_71 = arith.constant 1 : index
    %c0_72 = arith.constant 0 : index
    %c0_73 = arith.constant 0 : index
    %263 = vector.load %arg5[%c1_71, %c0_72, %c0_73] : memref<2x4x256xf32, #tpu.memory_space<vmem>>, vector<1x4x256xf32>
    %264 = vector.shape_cast %263 : vector<1x4x256xf32> to vector<4x256xf32>
    %cst_74 = arith.constant dense<0.000000e+00> : vector<4xf32>
    %265 = vector.multi_reduction <add>, %260, %cst_74 [1] : vector<4x256xf32> to vector<4xf32>
    %266 = vector.shape_cast %265 : vector<4xf32> to vector<4x1xf32>
    %cst_75 = arith.constant dense<0.000000e+00> : vector<1xf32>
    %267 = vector.multi_reduction <add>, %266, %cst_75 [0] : vector<4x1xf32> to vector<1xf32>
    %268 = vector.shape_cast %267 : vector<1xf32> to vector<1x1xf32>
    %269 = arith.mulf %260, %260 : vector<4x256xf32>
    %cst_76 = arith.constant dense<0.000000e+00> : vector<4xf32>
    %270 = vector.multi_reduction <add>, %269, %cst_76 [1] : vector<4x256xf32> to vector<4xf32>
    %271 = vector.shape_cast %270 : vector<4xf32> to vector<4x1xf32>
    %cst_77 = arith.constant dense<0.000000e+00> : vector<1xf32>
    %272 = vector.multi_reduction <add>, %271, %cst_77 [0] : vector<4x1xf32> to vector<1xf32>
    %273 = vector.shape_cast %272 : vector<1xf32> to vector<1x1xf32>
    %cst_78 = arith.constant 9.765625E-4 : f32
    %274 = vector.broadcast %cst_78 : f32 to vector<1x1xf32>
    %275 = arith.mulf %268, %274 : vector<1x1xf32>
    %cst_79 = arith.constant 9.765625E-4 : f32
    %276 = vector.broadcast %cst_79 : f32 to vector<1x1xf32>
    %277 = arith.mulf %273, %276 : vector<1x1xf32>
    %278 = arith.mulf %275, %275 : vector<1x1xf32>
    %279 = arith.subf %277, %278 : vector<1x1xf32>
    %cst_80 = arith.constant 9.99999974E-6 : f32
    %280 = vector.broadcast %cst_80 : f32 to vector<1x1xf32>
    %281 = arith.addf %279, %280 : vector<1x1xf32>
    %282 = math.rsqrt %281 : vector<1x1xf32>
    %283 = vector.broadcast %275 : vector<1x1xf32> to vector<4x256xf32>
    %284 = arith.subf %260, %283 : vector<4x256xf32>
    %285 = vector.broadcast %282 : vector<1x1xf32> to vector<4x256xf32>
    %286 = arith.mulf %285, %262 : vector<4x256xf32>
    %287 = arith.mulf %284, %286 : vector<4x256xf32>
    %288 = arith.addf %287, %264 : vector<4x256xf32>
    %289 = arith.addf %11, %288 : vector<4x256xf32>
    %290 = arith.addf %162, %289 : vector<4x256xf32>
    %cst_81 = arith.constant 5.000000e-01 : f32
    %291 = vector.broadcast %cst_81 : f32 to vector<4x256xf32>
    %292 = arith.mulf %290, %291 : vector<4x256xf32>
    %c0_82 = arith.constant 0 : index
    %c0_83 = arith.constant 0 : index
    %c0_84 = arith.constant 0 : index
    %293 = vector.load %arg6[%c0_82, %c0_83, %c0_84] : memref<1x4x256xf32, #tpu.memory_space<vmem>>, vector<1x4x256xf32>
    %294 = vector.shape_cast %293 : vector<1x4x256xf32> to vector<4x256xf32>
    %295 = vector.shape_cast %292 : vector<4x256xf32> to vector<1x4x256xf32>
    tpu.vector_store %arg6[%c0_82, %c0_83, %c0_84], %295 {strides = array<i32>} : memref<1x4x256xf32, #tpu.memory_space<vmem>>, vector<1x4x256xf32>,
    return
  }
  func.func @transform_0(%arg0: i32) -> (i32, i32, i32) {
    %c0_i32 = arith.constant 0 : i32
    %c0_i32_0 = arith.constant 0 : i32
    %c0_i32_1 = arith.constant 0 : i32
    return %arg0, %c0_i32, %c0_i32_0 : i32, i32, i32
  }
  func.func @transform_1(%arg0: i32) -> (i32, i32, i32) {
    %c0_i32 = arith.constant 0 : i32
    %c0_i32_0 = arith.constant 0 : i32
    %c0_i32_1 = arith.constant 0 : i32
    %c0_i32_2 = arith.constant 0 : i32
    return %c0_i32, %c0_i32_0, %c0_i32_1 : i32, i32, i32
  }
  func.func @transform_2(%arg0: i32) -> (i32, i32, i32) {
    %c0_i32 = arith.constant 0 : i32
    %c0_i32_0 = arith.constant 0 : i32
    %c0_i32_1 = arith.constant 0 : i32
    %c0_i32_2 = arith.constant 0 : i32
    return %c0_i32, %c0_i32_0, %c0_i32_1 : i32, i32, i32
  }
  func.func @transform_3(%arg0: i32) -> (i32, i32, i32) {
    %c0_i32 = arith.constant 0 : i32
    %c0_i32_0 = arith.constant 0 : i32
    %c0_i32_1 = arith.constant 0 : i32
    %c0_i32_2 = arith.constant 0 : i32
    return %c0_i32, %c0_i32_0, %c0_i32_1 : i32, i32, i32
  }
  func.func @transform_4(%arg0: i32) -> (i32, i32, i32) {
    %c0_i32 = arith.constant 0 : i32
    %c0_i32_0 = arith.constant 0 : i32
    %c0_i32_1 = arith.constant 0 : i32
    %c0_i32_2 = arith.constant 0 : i32
    return %c0_i32, %c0_i32_0, %c0_i32_1 : i32, i32, i32
  }
  func.func @transform_5(%arg0: i32) -> (i32, i32, i32) {
    %c0_i32 = arith.constant 0 : i32
    %c0_i32_0 = arith.constant 0 : i32
    %c0_i32_1 = arith.constant 0 : i32
    return %arg0, %c0_i32, %c0_i32_0 : i32, i32, i32
  }
}

</mosaic_0001>

<bundles_post_ra>
// kernel: tpu_custom_call.1
= control target key start
LH: loop header
LB: loop body
LE: loop exit
PB: predicated region body
PF: predicated region fallthrough
CT: control target
= control target key end

     0   :  { %10 = vsyncpa [#allocation3], 0  ;;  %s1629_s0 = inlined_call_operand.vmem [shape: f32[2,4,256], index: 0, kind: input, shape index: {}]   ;;  %s1630_s1 = inlined_call_operand.hbm [shape: f32[4,4,4], index: 1, kind: input, shape index: {}]   ;;  %s1631_s2 = inlined_call_operand.vmem [shape: f32[4,4,1], index: 2, kind: input, shape index: {}]   ;;  %s1632_s3 = inlined_call_operand.hbm [shape: f32[2,4,256], index: 3, kind: input, shape index: {}]   ;;  %s1633_s4 = inlined_call_operand.hbm [shape: f32[2,4,256], index: 4, kind: input, shape index: {}]   ;;  %s1634_s5 = inlined_call_operand.hbm [shape: f32[2,4,256], index: 5, kind: output, shape index: {}]  }
   0x1   :  { %11 = vsyncpa [#allocation6], 0 }
   0x2   :  { %12 = vsyncpa [#allocation4], 0 }
   0x3   :  { %14 = vsyncpa [#allocation4 + $0x1], 0  ;;  %s1319_s18 = smov 0   ;;  %s1321_s19 = smov 0  }
   0x4   :  { %s1323_s20 = smov 0   ;;  %s1325_s21 = smov 0  }
   0x5 LB: > { %s1340_s22 = sadd.s32 4294967295, %s1272_s21   ;;  %s962_s23 = sadd.s32 4294967294, %s1272_s21   ;;  %s1272_s21 = sphi %s1325_s21, %s1650_s21   ;;  %s1268_s20 = sphi %s1323_s20, %s1649_s20   ;;  %s1264_s19 = sphi %s1321_s19, %s1648_s19   ;;  %s1260_s18 = sphi %s1319_s18, %s1647_s18  }
   0x6   : > { %s1344_s24 = sadd.s32 1, %s1272_s21   ;;  %s137_s25 = sadd.s32 1, %s1268_s20 }
   0x7   : > { %s134_s26 = ssub.s32 %s1272_s21, %s1344_s24  ;;  %p147_p0 = scmp.ne.s32.totalorder %s1268_s20, %s1264_s19 }
   0x8   : > { %p135_p1 = scmp.eq.s32.totalorder %s134_s26, 0  ;;  %p148_p2 = scmp.eq.s32.totalorder %s1340_s22, 1 }
   0x9   : > { %p153_p3 = scmp.ne.s32.totalorder %s1264_s19, %s1260_s18  ;;  %p154_p4 = scmp.eq.s32.totalorder %s962_s23, 1 }
   0xa   : > { %s1355_s27 = scalar_select %p135_p1, %s1268_s20, %s137_s25  }
   0xb   : > { %p1357_p5 = por %p148_p2, %p147_p0  ;;  %p1361_p6 = por %p154_p4, %p153_p3 }
   0xc   : > { %p963_p7 = scmp.ge.s32.totalorder %s1272_s21, 1  ;;  %p161_p8 = scmp.lt.s32.totalorder %s1272_s21, 3 }
   0xd   : > { %p1021_p9 = scmp.eq.s32.totalorder %s1340_s22, 0  ;;  %s189_s8 = sshll.u32 %s1632_s3, 4  ;;  %s190_s8 = int_to_ptr.hbm [resolvable:$true] %s189_s8 }
   0xe   : > { %p1368_p10 = pnand %p963_p7, %p161_p8  ;;  %s1274_s9 = smov [#allocation5]  }
   0xf   : > { %s191_s10 = sshll.u32 %s1274_s9, 4  ;;  %s172_s14 = sshll.u32 %s1630_s1, 4  ;;  %s192_s10 = int_to_ptr.vmem [resolvable:$true] %s191_s10  ;;  %s173_s14 = int_to_ptr.hbm [resolvable:$true] %s172_s14 }
  0x10   : > { %p1007_p11 = pneg %p1368_p10  ;;  %s1275_s15 = smov 128  }
  0x11   : > { %s1276_s16 = smov 8   ;;  %s1277_s17 = smov [#allocation2]  }
  0x12   : > { %p1379_p12 = pnand %p1021_p9, %p1007_p11  ;;  %s174_s23 = sshll.u32 %s1277_s17, 4  ;;  %s175_s23 = int_to_ptr.vmem [resolvable:$true] %s174_s23 }
  0x13   : > { %s1278_s25 = smov 64   ;;  %s1279_s26 = smov 4  }
  0x14   : > { %1013 = dma.hbm_to_vmem [thread:$0]  (!%p1379_p12), %s190_s8, 256, %s192_s10, [#allocation6], %s1275_s15, %s1275_s15, %s1276_s16  }
  0x15   : > { %1010 = dma.hbm_to_vmem [thread:$0]  (!%p1379_p12), %s173_s14, 256, %s175_s23, [#allocation3], %s1278_s25, %s1278_s25, %s1279_s26  }
  0x16   : > { %s203_s9 = sshll.u32 %s1633_s4, 4  ;;  %s1280_s12 = smov [#allocation7]   ;;  %s204_s9 = int_to_ptr.hbm [resolvable:$true] %s203_s9 }
  0x17   : > { %s205_s13 = sshll.u32 %s1280_s12, 4  ;;  %229 = sbr.rel (%p1368_p10) target bundleno = 818 (0x332), region = 40  ;;  %s206_s13 = int_to_ptr.vmem [resolvable:$true] %s205_s13 }
  0x18   : > { %1016 = dma.hbm_to_vmem [thread:$0]  (!%p1379_p12), %s204_s9, 256, %s206_s13, [#allocation6], %s1275_s15, %s1275_s15, %s1276_s16  }
  0x1c   : > { %1247 = dma.done.wait (%p1021_p9), [#allocation3], 256  }
  0x1d   : > { %1249 = vsyncadd (%p1021_p9), [#allocation3], 4294967040 }
  0x1e   : > { %1251 = dma.done.wait (%p1021_p9), [#allocation6], 512  }
  0x1f   : > { %1253 = vsyncadd (%p1021_p9), [#allocation6], 4294966784  ;;  %v1281_v0 = vmov 0   ;;  %v1282_v1 = vmov 2   ;;  %v302_v2 = vld [vmem:[#allocation2] sm:$0xf] }
  0x20   : > { %1075 = vset.pattern.permute.xlu0 %v1281_v0  ;;  %1077 = vset.pattern.permute.xlu1 %v1282_v1  ;;  %v303_v3 = vld [vmem:[%s1631_s2] sm:$0xf]  ;;  %v1283_v4 = vmov 1   ;;  %v1284_v5 = vmov 3   ;;  %p268_p13 = scmp.lt.s32.totalorder %s1340_s22, 1  ;;  %vm284_vm0 = vcmask 1041408  }
  0x21   : > { %1079 = vset.pattern.permute.xlu2 %v1281_v0  ;;  %306 = vperm.xlu0 %1075, %v302_v2   ;;  %vm287_vm1 = vcmask 1042432   ;;  %s1285_s17 = smov 1   ;;  %s1286_s23 = smov 127  }
  0x22   : > { %324 = vperm.xlu1 %1077, %v302_v2   ;;  %345 = vperm.xlu2 %1079, %v303_v3   ;;  %s269_s10 = scalar_select %p268_p13, %s1340_s22, 1 }
  0x23   : > { %s1287_s25 = smov 112   ;;  %s1288_s26 = smov 16  }
  0x24   : > { %s991_s11 = sshll.u32 %s269_s10, 3  ;;  %s265_s8 = sand.u32 1, %s1264_s19  }
  0x25   : > { %s272_s16 = scalar_lea.vmem %s1629_s0, %s991_s11  ;;  %s972_s10 = sshll.u32 %s265_s8, 3 }
  0x26   : > { %v1419_v6 = vld [vmem:[%s272_s16] sm:$0xff]  ;;  %s992_s11 = sshll.u32 %s1340_s22, 3  ;;  %s856_s22 = scalar_lea.sflag [#allocation4], %s265_s8 }
  0x27   : > { %v290_v7 = vperm.slane %v1419_v6, 2  ;;  %v291_v8 = vperm.slane %v1419_v6, 6  ;;  %v294_v9 = vperm.slane %v1419_v6, 3  ;;  %v295_v10 = vperm.slane %v1419_v6, 7  ;;  %s867_s16 = scalar_lea.hbm %s1634_s5, %s992_s11  ;;  %s1222_s12 = scalar_lea.hbm %s1634_s5, 16 }
  0x29   : > { %1076 = vset.pattern.permute.xlu0 %v1283_v4  ;;  %v298_v12 = vsel %vm284_vm0, %v290_v7, %v294_v9  ;;  %v299_v13 = vsel %vm284_vm0, %v291_v8, %v295_v10 }
  0x2a   : > { %1078 = vset.pattern.permute.xlu1 %v1284_v5  ;;  %314 = vperm.xlu0 %1076, %v302_v2   ;;  %v1428_v15 = vsel %vm287_vm1, %v298_v12, %v294_v9  ;;  %v1431_v16 = vsel %vm287_vm1, %v299_v13, %v295_v10 }
  0x2b   : > { %334 = vperm.xlu1 %1078, %v302_v2   ;;  %v309_v17 = vperm.slane %v1428_v15, 0  ;;  %v310_v18 = vperm.slane %v1431_v16, 0  ;;  %v317_v19 = vperm.slane %v1428_v15, 1  ;;  %v318_v20 = vperm.slane %v1431_v16, 1 }
  0x2c   : > { %v327_v21 = vperm.slane %v1428_v15, 2  ;;  %v328_v22 = vperm.slane %v1431_v16, 2  ;;  %v337_v23 = vperm.slane %v1428_v15, 3  ;;  %v338_v24 = vperm.slane %v1431_v16, 3 }
  0x33   : > { %1080 = vset.pattern.permute.xlu1 %v1282_v1 }
  0x7c   : > { %v346_v39 = vpop.permute.xlu2 %345 }
  0x93   : > { %v307_v11 = vpop.permute.xlu0 %306 }
  0x94   : > { %v325_v14 = vpop.permute.xlu1 %324  ;;  %v311_v27 = vmul.f32 %v309_v17, %v307_v11  ;;  %v312_v28 = vmul.f32 %v310_v18, %v307_v11 }
  0x95   : > { %v329_v31 = vmul.f32 %v327_v21, %v325_v14  ;;  %v330_v32 = vmul.f32 %v328_v22, %v325_v14 }
  0x9c   : > { %v315_v25 = vpop.permute.xlu0 %314 }
  0x9d   : > { %v335_v26 = vpop.permute.xlu1 %334  ;;  %v319_v29 = vmul.f32 %v317_v19, %v315_v25  ;;  %v320_v30 = vmul.f32 %v318_v20, %v315_v25 }
  0x9e   : > { %v339_v35 = vmul.f32 %v337_v23, %v335_v26  ;;  %v340_v36 = vmul.f32 %v338_v24, %v335_v26 }
  0x9f   : > { %v321_v33 = vadd.f32 %v319_v29, %v311_v27  ;;  %v322_v34 = vadd.f32 %v320_v30, %v312_v28 }
  0xa1   : > { %v331_v37 = vadd.f32 %v329_v31, %v321_v33  ;;  %v332_v38 = vadd.f32 %v330_v32, %v322_v34 }
  0xa3   : > { %v341_v40 = vadd.f32 %v339_v35, %v331_v37  ;;  %v342_v41 = vadd.f32 %v340_v36, %v332_v38 }
  0xa5   : > { %v1441_v42 = vadd.f32 %v346_v39, %v341_v40  ;;  %v1443_v43 = vadd.f32 %v346_v39, %v342_v41 }
  0xa7   : > { %v1446_v44 = vmul.f32 0.70710677, %v1441_v42  ;;  %v1449_v45 = vmul.f32 0.70710677, %v1443_v43 }
  0xa9   : > { %v352_v46 = vand.u32 2147483647, %v1446_v44  ;;  %v353_v47 = vand.u32 2147483647, %v1449_v45  ;;  %vm418_vm10 = vcmp.ge.f32.partialorder %v1446_v44, 0.0  ;;  %vm419_vm11 = vcmp.ge.f32.partialorder %v1449_v45, 0.0 }
  0xaa   : > { %v1473_v44 = vld [vmem:[#allocation2 + $0x8] sm:$0xf] }
  0xab   : > { %v354_v48 = vmul.f32 0.3275911, %v352_v46  ;;  %v355_v49 = vmul.f32 0.3275911, %v353_v47  ;;  %v406_v12 = vsub.f32 0.0, %v352_v46  ;;  %v407_v17 = vsub.f32 0.0, %v353_v47 }
  0xad   : > { %v356_v50 = vadd.f32 1.0, %v354_v48  ;;  %v357_v51 = vadd.f32 1.0, %v355_v49  ;;  %v408_v21 = vmul.f32 %v406_v12, %v352_v46  ;;  %v409_v23 = vmul.f32 %v407_v17, %v353_v47 }
  0xaf   : > { %1092 = vrcp.f32 %v356_v50  ;;  %v369_v57 = vand.u32 2147483648, %v356_v50  ;;  %v367_v60 = vand.u32 2147483647, %v356_v50  ;;  %v384_v61 = vand.u32 2147483648, %v357_v51 }
  0xb0   : > { %1094 = vrcp.f32 %v357_v51  ;;  %v382_v63 = vand.u32 2147483647, %v357_v51  ;;  %vm363_vm4 = vweird.f32 %v356_v50  ;;  %vm378_vm6 = vweird.f32 %v357_v51 }
  0xb1   : > { %v370_v3 = vor.u32 1.1754944e-38, %v369_v57  ;;  %vm368_vm7 = vcmp.eq.f32.partialorder %v367_v60, 8.507059e+37  ;;  %v385_v9 = vor.u32 1.1754944e-38, %v384_v61  ;;  %v410_v27 = vmul.f32 1.442695, %v408_v21 }
  0xb2   : > { %vm383_vm9 = vcmp.eq.f32.partialorder %v382_v63, 8.507059e+37  ;;  %v412_v29 = vmul.f32 1.442695, %v409_v23 }
  0xb3   : > { %1096 = vpow2.f32 %v410_v27 }
  0xb4   : > { %1098 = vpow2.f32 %v412_v29 }
  0xb5   : > { %v1093_v52 = vpop.eup %1092 }
  0xb6   : > { %v1095_v53 = vpop.eup %1094  ;;  %v359_v54 = vmul.f32 %v1093_v52, %v356_v50  ;;  %vm364_vm2 = vweird.f32 %v1093_v52 }
  0xb7   : > { %v374_v55 = vmul.f32 %v1095_v53, %v357_v51  ;;  %vm379_vm3 = vweird.f32 %v1095_v53  ;;  %vm365_vm5 = vmor %vm363_vm4, %vm364_vm2 }
  0xb8   : > { %v360_v56 = vsub.f32 1.0, %v359_v54  ;;  %vm380_vm8 = vmor %vm378_vm6, %vm379_vm3 }
  0xb9   : > { %v375_v58 = vsub.f32 1.0, %v374_v55  ;;  %v1097_v38 = vpop.eup %1096  ;;  %v425_v55 = vmul.f32 0.5, %v1443_v43  ;;  %v979_v43 = vld [vmem:[%s1631_s2 + $0x4] sm:$0xf] }
  0xba   : > { %v361_v59 = vmul.f32 %v1093_v52, %v360_v56  ;;  %v1099_v40 = vpop.eup %1098 }
  0xbb   : > { %v376_v62 = vmul.f32 %v1095_v53, %v375_v58 }
  0xbc   : > { %v362_v2 = vadd.f32 %v1093_v52, %v361_v59  ;;  %v430_v59 = vlaneseq }
  0xbd   : > { %v377_v7 = vadd.f32 %v1095_v53, %v376_v62 }
  0xbe   : > { %v366_v8 = vsel %vm365_vm5, %v1093_v52, %v362_v2  ;;  %v431_v61 = vand.u32 127, %v430_v59  ;;  %vm283_vm5 = vcmask 1040384  }
  0xbf   : > { %v371_v10 = vsel %vm368_vm7, %v370_v3, %v366_v8  ;;  %v381_v11 = vsel %vm380_vm8, %v1095_v53, %v377_v7  ;;  %v424_v53 = vmul.f32 0.5, %v1441_v42  ;;  %v485_v42 = vld [vmem:[#allocation2 + $0x4] sm:$0xf]  ;;  %vm536_vm8 = vcmask 1043456  }
  0xc0   : > { %v386_v13 = vsel %vm383_vm9, %v385_v9, %v381_v11  ;;  %v388_v14 = vmul.f32 1.0614054, %v371_v10  ;;  %v432_v2 = vadd.s32 128, %v431_v61  ;;  %v433_v3 = vand.u32 15, %v431_v61 }
  0xc1   : > { %v389_v18 = vmul.f32 1.0614054, %v386_v13  ;;  %vm452_vm12 = vcmp.lt.s32.totalorder %v431_v61, 127  ;;  %vm441_vm13 = vcmp.lt.s32.totalorder %v431_v61, 1  ;;  %vm457_vm14 = vcmp.lt.s32.totalorder %v431_v61, 16 }
  0xc2   : > { %v975_v19 = vadd.f32 -1.4531521, %v388_v14  ;;  %v434_v8 = vand.u32 15, %v432_v2  ;;  %vm1483_vm15 = vcmp.eq.s32.totalorder %v433_v3, 15  ;;  %vm1491_vm3 = vcmp.eq.s32.totalorder %v433_v3, 0 }
  0xc3   : > { %v976_v20 = vadd.f32 -1.4531521, %v389_v18  ;;  %vm473_vm6 = vcmp.lt.s32.totalorder %v431_v61, 112  ;;  %vm468_vm7 = vcmp.ge.s32.totalorder %v432_v2, 240 }
  0xc4   : > { %v392_v22 = vmul.f32 %v975_v19, %v371_v10  ;;  %vm1487_vm2 = vcmp.eq.s32.totalorder %v434_v8, 15  ;;  %vm1495_vm4 = vcmp.eq.s32.totalorder %v434_v8, 0  ;;  %v980_v19 = vld [vmem:[%s1631_s2 + $0x8] sm:$0xf] }
  0xc5   : > { %v393_v24 = vmul.f32 %v976_v20, %v386_v13 }
  0xc6   : > { %v394_v25 = vadd.f32 1.4214138, %v392_v22 }
  0xc7   : > { %v395_v26 = vadd.f32 1.4214138, %v393_v24 }
  0xc8   : > { %v396_v28 = vmul.f32 %v394_v25, %v371_v10 }
  0xc9   : > { %v397_v30 = vmul.f32 %v395_v26, %v386_v13 }
  0xca   : > { %v977_v31 = vadd.f32 -0.28449672, %v396_v28 }
  0xcb   : > { %v978_v32 = vadd.f32 -0.28449672, %v397_v30 }
  0xcc   : > { %v400_v33 = vmul.f32 %v977_v31, %v371_v10 }
  0xcd   : > { %v401_v34 = vmul.f32 %v978_v32, %v386_v13 }
  0xce   : > { %v402_v35 = vadd.f32 0.2548296, %v400_v33 }
  0xcf   : > { %v403_v36 = vadd.f32 0.2548296, %v401_v34 }
  0xd0   : > { %v404_v37 = vmul.f32 %v402_v35, %v371_v10 }
  0xd1   : > { %v405_v39 = vmul.f32 %v403_v36, %v386_v13 }
  0xd2   : > { %v414_v41 = vmul.f32 %v1097_v38, %v404_v37 }
  0xd3   : > { %v415_v46 = vmul.f32 %v1099_v40, %v405_v39 }
  0xd4   : > { %v416_v47 = vsub.f32 1.0, %v414_v41 }
  0xd5   : > { %v417_v48 = vsub.f32 1.0, %v415_v46 }
  0xd6   : > { %v420_v49 = vsub.f32 0.0, %v416_v47 }
  0xd7   : > { %v421_v50 = vsub.f32 0.0, %v417_v48 }
  0xd8   : > { %v422_v51 = vsel %vm418_vm10, %v416_v47, %v420_v49 }
  0xd9   : > { %v423_v52 = vsel %vm419_vm11, %v417_v48, %v421_v50  ;;  %v426_v54 = vadd.f32 1.0, %v422_v51 }
  0xda   : > { %v427_v56 = vadd.f32 1.0, %v423_v52 }
  0xdb   : > { %v1457_v57 = vmul.f32 %v426_v54, %v424_v53 }
  0xdc   : > { %v1459_v58 = vmul.f32 %v427_v56, %v425_v55 }
  0xdd   : > { %437 = vrot.lane.b32.xlu2 %v1457_v57, %s1285_s17 }
  0xde   : > { %450 = vrot.lane.b32.xlu0 %v1459_v58, %s1286_s23  ;;  %439 = vrot.lane.b32.xlu1 %v1459_v58, %s1285_s17  ;;  %s267_s17 = scalar_lea.vmem [#allocation8], %s972_s10 }
  0xe5   : > { %448 = vrot.lane.b32.xlu2 %v1457_v57, %s1286_s23  ;;  %s869_s23 = sshll.u32 %s267_s17, 4  ;;  %s870_s23 = int_to_ptr.vmem [resolvable:$true] %s869_s23 }
  0xe6   : > { %469 = vrot.lane.b32.xlu0 %v1457_v57, %s1287_s25  ;;  %459 = vrot.lane.b32.xlu1 %v1457_v57, %s1288_s26 }
  0xed   : > { %461 = vrot.lane.b32.xlu2 %v1459_v58, %s1288_s26 }
  0xee   : > { %498 = vperm.xlu0 %1076, %v485_v42   ;;  %471 = vrot.lane.b32.xlu1 %v1459_v58, %s1287_s25  ;;  %s871_s25 = sshll.u32 %s867_s16, 4  ;;  %s872_s25 = int_to_ptr.hbm [resolvable:$true] %s871_s25 }
  0xef   : > { %s1216_s26 = sshra.s32 %s872_s25, 4  ;;  %s1217_s26 = int_to_ptr.hbm [resolvable:$true] %s1216_s26 }
  0xf0   : > { %s1218_s6 = scalar_lea.hbm %s1217_s26, 8  ;;  %p1223_p3 = scmp.lt.s32.totalorder %s1217_s26, %s1634_s5 }
  0xf1   : > { %p1219_p0 = scmp.ne.s32.totalorder %s1217_s26, %s1218_s6  ;;  %p1224_p4 = scmp.lt.s32.totalorder %s1222_s12, %s1218_s6 }
  0xf3   : > { %p1220_p1 = pnand %p1219_p0, %p1357_p5  ;;  %p1225_p7 = por %p1224_p4, %p1223_p3 }
  0xf5   : > { %490 = vperm.xlu2 %1079, %v485_v42   ;;  %p1221_p2 = pneg %p1220_p1 }
  0xf6   : > { %1082 = vset.pattern.permute.xlu0 %v1281_v0  ;;  %508 = vperm.xlu1 %1080, %v485_v42  }
  0xf7   : > { %529 = vperm.xlu0 %1082, %v979_v43   ;;  %p1226_p8 = pnand %p1225_p7, %p1221_p2 }
  0xfd   : > { %1081 = vset.pattern.permute.xlu2 %v1284_v5 }
  0xfe   : > { %518 = vperm.xlu2 %1081, %v485_v42   ;;  %1085 = vset.pattern.permute.xlu1 %v1281_v0 }
  0xff   : > { %605 = vperm.xlu0 %1082, %v1473_v44  }
 0x107   : > { %1083 = vset.pattern.permute.xlu0 %v1283_v4 }
 0x108   : > { %613 = vperm.xlu0 %1083, %v1473_v44  }
 0x110   : > { %1084 = vset.pattern.permute.xlu0 %v1282_v1 }
 0x111   : > { %623 = vperm.xlu0 %1084, %v1473_v44  }
 0x119   : > { %1086 = vset.pattern.permute.xlu0 %v1281_v0 }
 0x137   : > { %v438_v45 = vpop.permute.xlu2 %437 }
 0x13f   : > { %v449_v60 = vpop.permute.xlu2 %448 }
 0x147   : > { %v462_v7 = vpop.permute.xlu2 %461 }
 0x14f   : > { %v491_v29 = vpop.permute.xlu2 %490 }
 0x150   : > { %v451_v62 = vpop.permute.xlu0 %450  ;;  %v440_v63 = vpop.permute.xlu1 %439 }
 0x151   : > { %v453_v12 = vsel %vm452_vm12, %v449_v60, %v451_v62  ;;  %v443_v14 = vsel %vm441_vm13, %v440_v63, %v438_v45  ;;  %v454_v18 = vsel %vm452_vm12, %v451_v62, %v449_v60  ;;  %v442_v20 = vsel %vm441_vm13, %v438_v45, %v440_v63 }
 0x152   : > { %v455_v22 = vsel %vm1483_vm15, %v1457_v57, %v453_v12  ;;  %v444_v23 = vsel %vm1491_vm3, %v1457_v57, %v443_v14  ;;  %v456_v24 = vsel %vm1487_vm2, %v1459_v58, %v454_v18  ;;  %v445_v25 = vsel %vm1495_vm4, %v1459_v58, %v442_v20  ;;  %v730_v20 = vld [vmem:[#allocation2 + $0xc] sm:$0xf] }
 0x153   : > { %v478_v28 = vsel %vm283_vm5, %v444_v23, %v455_v22  ;;  %v479_v31 = vsel %vm283_vm5, %v445_v25, %v456_v24  ;;  %735 = vperm.xlu0 %1086, %v730_v20  }
 0x158   : > { %v460_v9 = vpop.permute.xlu1 %459  ;;  %v470_v17 = vpop.permute.xlu0 %469 }
 0x159   : > { %v464_v21 = vsel %vm457_vm14, %v462_v7, %v460_v9  ;;  %v463_v27 = vsel %vm457_vm14, %v460_v9, %v462_v7  ;;  %v519_v56 = vpop.permute.xlu2 %518 }
 0x15a   : > { %v465_v26 = vsel %vm457_vm14, %v1457_v57, %v464_v21  ;;  %v481_v35 = vsel %vm284_vm0, %v479_v31, %v463_v27 }
 0x15b   : > { %v480_v34 = vsel %vm284_vm0, %v478_v28, %v465_v26  ;;  %1089 = vset.pattern.permute.xlu0 %v1284_v5 }
 0x15c   : > { %763 = vperm.xlu0 %1089, %v730_v20  }
 0x160   : > { %v472_v30 = vpop.permute.xlu1 %471  ;;  %v499_v41 = vpop.permute.xlu0 %498 }
 0x161   : > { %v474_v32 = vsel %vm473_vm6, %v470_v17, %v472_v30  ;;  %v475_v33 = vsel %vm473_vm6, %v472_v30, %v470_v17 }
 0x162   : > { %v477_v36 = vsel %vm468_vm7, %v1459_v58, %v475_v33  ;;  %v482_v37 = vsel %vm287_vm1, %v480_v34, %v474_v32 }
 0x163   : > { %v483_v38 = vsel %vm287_vm1, %v481_v35, %v477_v36  ;;  %v493_v39 = vperm.slane %v482_v37, 0  ;;  %v501_v40 = vperm.slane %v482_v37, 1  ;;  %v521_v52 = vperm.slane %v482_v37, 3  ;;  %v985_v35 = vld [vmem:[%s1631_s2 + $0xc] sm:$0xf] }
 0x164   : > { %v494_v46 = vperm.slane %v483_v38, 0  ;;  %v502_v47 = vperm.slane %v483_v38, 1  ;;  %v522_v53 = vperm.slane %v483_v38, 3  ;;  %v511_v54 = vperm.slane %v482_v37, 2  ;;  %1091 = vset.pattern.permute.xlu0 %v1281_v0 }
 0x165   : > { %v495_v48 = vmul.f32 %v493_v39, %v491_v29  ;;  %v503_v49 = vmul.f32 %v501_v40, %v499_v41  ;;  %v512_v55 = vperm.slane %v483_v38, 2  ;;  %v523_v59 = vmul.f32 %v521_v52, %v519_v56  ;;  %v535_v52 = vld [vmem:[#allocation7] sm:$0xff] }
 0x166   : > { %v496_v50 = vmul.f32 %v494_v46, %v491_v29  ;;  %v504_v51 = vmul.f32 %v502_v47, %v499_v41  ;;  %v524_v60 = vmul.f32 %v522_v53, %v519_v56  ;;  %v534_v47 = vld [vmem:[#allocation5] sm:$0xff]  ;;  %v276_v56 = vperm.slane %v1419_v6, 4 }
 0x167   : > { %v505_v42 = vadd.f32 %v503_v49, %v495_v48 }
 0x168   : > { %v509_v57 = vpop.permute.xlu1 %508  ;;  %v506_v58 = vadd.f32 %v504_v51, %v496_v50 }
 0x169   : > { %v513_v43 = vmul.f32 %v511_v54, %v509_v57  ;;  %v514_v45 = vmul.f32 %v512_v55, %v509_v57  ;;  %v530_v3 = vpop.permute.xlu0 %529  ;;  %v275_v55 = vperm.slane %v1419_v6, 0  ;;  %v279_v57 = vperm.slane %v1419_v6, 1 }
 0x16b   : > { %v515_v61 = vadd.f32 %v513_v43, %v505_v42  ;;  %v516_v62 = vadd.f32 %v514_v45, %v506_v58  ;;  %v280_v58 = vperm.slane %v1419_v6, 5  ;;  %v285_v45 = vsel %vm284_vm0, %v275_v55, %v279_v57 }
 0x16d   : > { %v525_v63 = vadd.f32 %v523_v59, %v515_v61  ;;  %v526_v2 = vadd.f32 %v524_v60, %v516_v62  ;;  %v286_v59 = vsel %vm284_vm0, %v276_v56, %v280_v58 }
 0x16f   : > { %v1520_v7 = vadd.f32 %v530_v3, %v525_v63  ;;  %v1522_v8 = vadd.f32 %v530_v3, %v526_v2  ;;  %v288_v63 = vsel %vm287_vm1, %v285_v45, %v279_v57  ;;  %v289_v2 = vsel %vm287_vm1, %v286_v59, %v280_v58 }
 0x171   : > { %v537_v9 = vsel %vm536_vm8, %v1520_v7, 0.0  ;;  %v538_v10 = vsel %vm536_vm8, %v1522_v8, 0.0  ;;  %v549_v11 = vmul.f32 %v1520_v7, %v1520_v7  ;;  %v550_v12 = vmul.f32 %v1522_v8, %v1522_v8  ;;  %v606_v51 = vpop.permute.xlu0 %605 }
 0x172   : > { %v539_v13 = vadd.f32 %v538_v10, %v537_v9 }
 0x173   : > { %v551_v14 = vsel %vm536_vm8, %v549_v11, 0.0  ;;  %v552_v17 = vsel %vm536_vm8, %v550_v12, 0.0 }
 0x174   : > { %540 = vadd.xlane.f32.xlu1 %v539_v13  ;;  %v553_v18 = vadd.f32 %v552_v17, %v551_v14 }
 0x176   : > { %554 = vadd.xlane.f32.xlu2 %v553_v18 }
 0x17a   : > { %v614_v60 = vpop.permute.xlu0 %613 }
 0x18d   : > { %644 = vperm.xlu1 %1085, %v980_v19  }
 0x18e   : > { %633 = vperm.xlu2 %1081, %v1473_v44  }
 0x195   : > { %1088 = vset.pattern.permute.xlu1 %v1282_v1 }
 0x196   : > { %1087 = vset.pattern.permute.xlu2 %v1283_v4  ;;  %753 = vperm.xlu1 %1088, %v730_v20  }
 0x197   : > { %743 = vperm.xlu2 %1087, %v730_v20  }
 0x19f   : > { %1090 = vset.pattern.permute.xlu2 %v1281_v0 }
 0x1a0   : > { %774 = vperm.xlu2 %1090, %v985_v35  }
 0x1e7   : > { %v541_v21 = vpop.xlane.xlu1 %540 }
 0x1e8   : > { %v542_v22 = vsel %vm536_vm8, %v541_v21, 0.0  ;;  %v624_v21 = vpop.permute.xlu0 %623 }
 0x1e9   : > { %v543_v23 = vrot.slane %v542_v22, 4  ;;  %v555_v44 = vpop.xlane.xlu2 %554 }
 0x1ea   : > { %v556_v1 = vsel %vm536_vm8, %v555_v44, 0.0 }
 0x1eb   : > { %v544_v24 = vadd.f32 %v543_v23, %v542_v22  ;;  %v557_v4 = vrot.slane %v556_v1, 4 }
 0x1ed   : > { %v545_v25 = vrot.slane %v544_v24, 2  ;;  %v558_v26 = vadd.f32 %v557_v4, %v556_v1 }
 0x1ef   : > { %v546_v27 = vadd.f32 %v545_v25, %v544_v24  ;;  %v559_v28 = vrot.slane %v558_v26, 2 }
 0x1f1   : > { %v547_v29 = vrot.slane %v546_v27, 1  ;;  %v560_v5 = vadd.f32 %v559_v28, %v558_v26 }
 0x1f3   : > { %v548_v30 = vadd.f32 %v547_v29, %v546_v27  ;;  %v561_v31 = vrot.slane %v560_v5, 1  ;;  %v634_v27 = vpop.permute.xlu2 %633 }
 0x1f5   : > { %v563_v32 = vmul.f32 0.0009765625, %v548_v30  ;;  %v562_v33 = vadd.f32 %v561_v31, %v560_v5 }
 0x1f7   : > { %v564_v0 = vmul.f32 0.0009765625, %v562_v33  ;;  %v565_v34 = vmul.f32 %v563_v32, %v563_v32  ;;  %v578_v42 = vsub.f32 %v1520_v7, %v563_v32  ;;  %v579_v43 = vsub.f32 %v1522_v8, %v563_v32 }
 0x1f9   : > { %v566_v36 = vsub.f32 %v564_v0, %v565_v34 }
 0x1fb   : > { %v567_v37 = vadd.f32 1e-05, %v566_v36 }
 0x1fd   : > { %1100 = vrsqrt.f32 %v567_v37  ;;  %vm574_vm10 = vweird.f32 %v567_v37 }
 0x1ff   : > { %v645_v31 = vpop.permute.xlu1 %644 }
 0x203   : > { %v1101_v38 = vpop.eup %1100 }
 0x204   : > { %v569_v39 = vmul.f32 %v1101_v38, %v567_v37  ;;  %vm575_vm9 = vweird.f32 %v1101_v38 }
 0x205   : > { %vm576_vm11 = vmor %vm574_vm10, %vm575_vm9 }
 0x206   : > { %v570_v40 = vmul.f32 %v1101_v38, %v569_v39 }
 0x208   : > { %v571_v41 = vmul.f32 0.5, %v570_v40 }
 0x20a   : > { %v572_v46 = vsub.f32 1.5, %v571_v41 }
 0x20c   : > { %v573_v48 = vmul.f32 %v1101_v38, %v572_v46 }
 0x20e   : > { %v577_v49 = vsel %vm576_vm11, %v1101_v38, %v573_v48 }
 0x20f   : > { %v580_v50 = vmul.f32 %v577_v49, %v534_v47 }
 0x211   : > { %582 = vst [vmem:[#allocation1] ss:$2 sm:$0xff] %v580_v50 }
 0x218   : > { %v583_v53 = vld.sshfl [vmem:[#allocation1] sm:$0xff pattern:$0x75316420]  ;;  %v584_v54 = vld.sshfl [vmem:[#allocation1 + $0x8] sm:$0xff pattern:$0x75316420] }
 0x219   : > { %590 = vst [vmem:[#allocation1] ss:$2 sm:$0xff] %v535_v52  ;;  %v587_v61 = vmul.f32 %v583_v53, %v578_v42  ;;  %v588_v62 = vmul.f32 %v584_v54, %v579_v43 }
 0x220   : > { %v591_v3 = vld.sshfl [vmem:[#allocation1] sm:$0xff pattern:$0x75316420]  ;;  %v592_v9 = vld.sshfl [vmem:[#allocation1 + $0x8] sm:$0xff pattern:$0x75316420] }
 0x221   : > { %v595_v10 = vadd.f32 %v591_v3, %v587_v61  ;;  %v596_v6 = vadd.f32 %v592_v9, %v588_v62 }
 0x223   : > { %v1558_v11 = vadd.f32 %v595_v10, %v288_v63  ;;  %v1560_v7 = vadd.f32 %v596_v6, %v289_v2 }
 0x225   : > { %v608_v8 = vperm.slane %v1558_v11, 0  ;;  %v609_v12 = vperm.slane %v1560_v7, 0  ;;  %v616_v13 = vperm.slane %v1558_v11, 1  ;;  %v617_v14 = vperm.slane %v1560_v7, 1 }
 0x226   : > { %v626_v17 = vperm.slane %v1558_v11, 2  ;;  %v627_v18 = vperm.slane %v1560_v7, 2  ;;  %v636_v22 = vperm.slane %v1558_v11, 3  ;;  %v637_v23 = vperm.slane %v1560_v7, 3 }
 0x227   : > { %v610_v19 = vmul.f32 %v608_v8, %v606_v51  ;;  %v611_v20 = vmul.f32 %v609_v12, %v606_v51  ;;  %v618_v44 = vmul.f32 %v616_v13, %v614_v60  ;;  %v619_v1 = vmul.f32 %v617_v14, %v614_v60 }
 0x228   : > { %v628_v25 = vmul.f32 %v626_v17, %v624_v21  ;;  %v629_v26 = vmul.f32 %v627_v18, %v624_v21  ;;  %v638_v28 = vmul.f32 %v636_v22, %v634_v27  ;;  %v639_v29 = vmul.f32 %v637_v23, %v634_v27 }
 0x229   : > { %v620_v24 = vadd.f32 %v618_v44, %v610_v19  ;;  %v621_v4 = vadd.f32 %v619_v1, %v611_v20 }
 0x22b   : > { %v630_v5 = vadd.f32 %v628_v25, %v620_v24  ;;  %v631_v30 = vadd.f32 %v629_v26, %v621_v4 }
 0x22d   : > { %v640_v32 = vadd.f32 %v638_v28, %v630_v5  ;;  %v641_v33 = vadd.f32 %v639_v29, %v631_v30 }
 0x22f   : > { %v1570_v0 = vadd.f32 %v645_v31, %v640_v32  ;;  %v1572_v34 = vadd.f32 %v645_v31, %v641_v33 }
 0x231   : > { %v1575_v35 = vmul.f32 0.70710677, %v1570_v0  ;;  %v1578_v36 = vmul.f32 0.70710677, %v1572_v34 }
 0x233   : > { %v651_v37 = vand.u32 2147483647, %v1575_v35  ;;  %v652_v38 = vand.u32 2147483647, %v1578_v36  ;;  %vm717_vm4 = vcmp.ge.f32.partialorder %v1575_v35, 0.0  ;;  %vm718_vm5 = vcmp.ge.f32.partialorder %v1578_v36, 0.0  ;;  %v754_v35 = vpop.permute.xlu1 %753 }
 0x235   : > { %v653_v39 = vmul.f32 0.3275911, %v651_v37  ;;  %v654_v40 = vmul.f32 0.3275911, %v652_v38  ;;  %v705_v63 = vsub.f32 0.0, %v651_v37  ;;  %v706_v9 = vsub.f32 0.0, %v652_v38 }
 0x237   : > { %v655_v41 = vadd.f32 1.0, %v653_v39  ;;  %v656_v46 = vadd.f32 1.0, %v654_v40  ;;  %v707_v12 = vmul.f32 %v705_v63, %v651_v37  ;;  %v708_v14 = vmul.f32 %v706_v9, %v652_v38  ;;  %v736_v38 = vpop.permute.xlu0 %735 }
 0x239   : > { %1102 = vrcp.f32 %v655_v41  ;;  %v668_v52 = vand.u32 2147483648, %v655_v41  ;;  %v666_v55 = vand.u32 2147483647, %v655_v41  ;;  %v683_v56 = vand.u32 2147483648, %v656_v46 }
 0x23a   : > { %1104 = vrcp.f32 %v656_v46  ;;  %v681_v58 = vand.u32 2147483647, %v656_v46  ;;  %vm662_vm12 = vweird.f32 %v655_v41  ;;  %vm677_vm14 = vweird.f32 %v656_v46 }
 0x23b   : > { %v669_v43 = vor.u32 1.1754944e-38, %v668_v52  ;;  %vm667_vm15 = vcmp.eq.f32.partialorder %v666_v55, 8.507059e+37  ;;  %v684_v60 = vor.u32 1.1754944e-38, %v683_v56  ;;  %v709_v20 = vmul.f32 1.442695, %v707_v12 }
 0x23c   : > { %vm682_vm3 = vcmp.eq.f32.partialorder %v681_v58, 8.507059e+37  ;;  %v711_v22 = vmul.f32 1.442695, %v708_v14 }
 0x23d   : > { %1106 = vpow2.f32 %v709_v20 }
 0x23e   : > { %1108 = vpow2.f32 %v711_v22 }
 0x23f   : > { %v1103_v47 = vpop.eup %1102 }
 0x240   : > { %v1105_v48 = vpop.eup %1104  ;;  %v658_v49 = vmul.f32 %v1103_v47, %v655_v41  ;;  %vm663_vm0 = vweird.f32 %v1103_v47 }
 0x241   : > { %v673_v50 = vmul.f32 %v1105_v48, %v656_v46  ;;  %vm678_vm1 = vweird.f32 %v1105_v48  ;;  %vm664_vm13 = vmor %vm662_vm12, %vm663_vm0  ;;  %v723_v46 = vmul.f32 0.5, %v1570_v0  ;;  %v764_v0 = vpop.permute.xlu0 %763 }
 0x242   : > { %v659_v51 = vsub.f32 1.0, %v658_v49  ;;  %vm679_vm2 = vmor %vm677_vm14, %vm678_vm1 }
 0x243   : > { %v674_v53 = vsub.f32 1.0, %v673_v50  ;;  %v1107_v28 = vpop.eup %1106  ;;  %v744_v50 = vpop.permute.xlu2 %743 }
 0x244   : > { %v660_v54 = vmul.f32 %v1103_v47, %v659_v51  ;;  %v1109_v5 = vpop.eup %1108 }
 0x245   : > { %v675_v57 = vmul.f32 %v1105_v48, %v674_v53 }
 0x246   : > { %v661_v42 = vadd.f32 %v1103_v47, %v660_v54 }
 0x247   : > { %v676_v45 = vadd.f32 %v1105_v48, %v675_v57 }
 0x248   : > { %v665_v59 = vsel %vm664_vm13, %v1103_v47, %v661_v42 }
 0x249   : > { %v670_v61 = vsel %vm667_vm15, %v669_v43, %v665_v59  ;;  %v680_v62 = vsel %vm679_vm2, %v1105_v48, %v676_v45  ;;  %v724_v48 = vmul.f32 0.5, %v1572_v34 }
 0x24a   : > { %v685_v2 = vsel %vm682_vm3, %v684_v60, %v680_v62  ;;  %v687_v3 = vmul.f32 1.0614054, %v670_v61 }
 0x24b   : > { %v688_v10 = vmul.f32 1.0614054, %v685_v2 }
 0x24c   : > { %v981_v6 = vadd.f32 -1.4531521, %v687_v3 }
 0x24d   : > { %v982_v8 = vadd.f32 -1.4531521, %v688_v10 }
 0x24e   : > { %v691_v13 = vmul.f32 %v981_v6, %v670_v61  ;;  %v775_v6 = vpop.permute.xlu2 %774 }
 0x24f   : > { %v692_v17 = vmul.f32 %v982_v8, %v685_v2 }
 0x250   : > { %v693_v18 = vadd.f32 1.4214138, %v691_v13 }
 0x251   : > { %v694_v19 = vadd.f32 1.4214138, %v692_v17 }
 0x252   : > { %v695_v21 = vmul.f32 %v693_v18, %v670_v61 }
 0x253   : > { %v696_v23 = vmul.f32 %v694_v19, %v685_v2 }
 0x254   : > { %v983_v44 = vadd.f32 -0.28449672, %v695_v21 }
 0x255   : > { %v984_v1 = vadd.f32 -0.28449672, %v696_v23 }
 0x256   : > { %v699_v24 = vmul.f32 %v983_v44, %v670_v61 }
 0x257   : > { %v700_v4 = vmul.f32 %v984_v1, %v685_v2 }
 0x258   : > { %v701_v25 = vadd.f32 0.2548296, %v699_v24 }
 0x259   : > { %v702_v26 = vadd.f32 0.2548296, %v700_v4 }
 0x25a   : > { %v703_v27 = vmul.f32 %v701_v25, %v670_v61 }
 0x25b   : > { %v704_v29 = vmul.f32 %v702_v26, %v685_v2 }
 0x25c   : > { %v713_v30 = vmul.f32 %v1107_v28, %v703_v27 }
 0x25d   : > { %v714_v31 = vmul.f32 %v1109_v5, %v704_v29 }
 0x25e   : > { %v715_v32 = vsub.f32 1.0, %v713_v30 }
 0x25f   : > { %v716_v33 = vsub.f32 1.0, %v714_v31 }
 0x260   : > { %v719_v37 = vsub.f32 0.0, %v715_v32 }
 0x261   : > { %v720_v39 = vsub.f32 0.0, %v716_v33 }
 0x262   : > { %v721_v40 = vsel %vm717_vm4, %v715_v32, %v719_v37 }
 0x263   : > { %v722_v41 = vsel %vm718_vm5, %v716_v33, %v720_v39  ;;  %v725_v47 = vadd.f32 1.0, %v721_v40 }
 0x264   : > { %v726_v49 = vadd.f32 1.0, %v722_v41 }
 0x265   : > { %v727_v51 = vmul.f32 %v725_v47, %v723_v46 }
 0x266   : > { %v728_v52 = vmul.f32 %v726_v49, %v724_v48 }
 0x267   : > { %v738_v53 = vperm.slane %v727_v51, 0  ;;  %v746_v54 = vperm.slane %v727_v51, 1  ;;  %v756_v55 = vperm.slane %v727_v51, 2  ;;  %v766_v43 = vperm.slane %v727_v51, 3 }
 0x268   : > { %v739_v56 = vperm.slane %v728_v52, 0  ;;  %v747_v57 = vperm.slane %v728_v52, 1  ;;  %v757_v58 = vperm.slane %v728_v52, 2  ;;  %v767_v60 = vperm.slane %v728_v52, 3 }
 0x269   : > { %v740_v42 = vmul.f32 %v738_v53, %v736_v38  ;;  %v748_v36 = vmul.f32 %v746_v54, %v744_v50  ;;  %v758_v34 = vmul.f32 %v756_v55, %v754_v35  ;;  %v768_v2 = vmul.f32 %v766_v43, %v764_v0  ;;  %v780_v54 = vld [vmem:[#allocation5 + $0x8] sm:$0xff] }
 0x26a   : > { %v741_v45 = vmul.f32 %v739_v56, %v736_v38  ;;  %v749_v59 = vmul.f32 %v747_v57, %v744_v50  ;;  %v759_v63 = vmul.f32 %v757_v58, %v754_v35  ;;  %v769_v9 = vmul.f32 %v767_v60, %v764_v0  ;;  %v782_v35 = vld [vmem:[#allocation7 + $0x8] sm:$0xff] }
 0x26b   : > { %v750_v61 = vadd.f32 %v748_v36, %v740_v42 }
 0x26c   : > { %v751_v62 = vadd.f32 %v749_v59, %v741_v45 }
 0x26d   : > { %v760_v3 = vadd.f32 %v758_v34, %v750_v61 }
 0x26e   : > { %v761_v10 = vadd.f32 %v759_v63, %v751_v62 }
 0x26f   : > { %v770_v8 = vadd.f32 %v768_v2, %v760_v3 }
 0x270   : > { %v771_v12 = vadd.f32 %v769_v9, %v761_v10 }
 0x271   : > { %v777_v13 = vadd.f32 %v775_v6, %v770_v8 }
 0x272   : > { %v778_v14 = vadd.f32 %v775_v6, %v771_v12 }
 0x273   : > { %v783_v17 = vsel %vm536_vm8, %v777_v13, 0.0  ;;  %v795_v18 = vmul.f32 %v777_v13, %v777_v13 }
 0x274   : > { %v784_v19 = vsel %vm536_vm8, %v778_v14, 0.0  ;;  %v796_v20 = vmul.f32 %v778_v14, %v778_v14 }
 0x275   : > { %v785_v21 = vadd.f32 %v784_v19, %v783_v17  ;;  %v797_v22 = vsel %vm536_vm8, %v795_v18, 0.0 }
 0x276   : > { %v798_v23 = vsel %vm536_vm8, %v796_v20, 0.0 }
 0x277   : > { %786 = vadd.xlane.f32.xlu1 %v785_v21  ;;  %v799_v44 = vadd.f32 %v798_v23, %v797_v22 }
 0x279   : > { %800 = vadd.xlane.f32.xlu2 %v799_v44 }
 0x2ea   : > { %v787_v1 = vpop.xlane.xlu1 %786 }
 0x2eb   : > { %v788_v24 = vsel %vm536_vm8, %v787_v1, 0.0 }
 0x2ec   : > { %v789_v4 = vrot.slane %v788_v24, 4  ;;  %v801_v25 = vpop.xlane.xlu2 %800 }
 0x2ed   : > { %v802_v26 = vsel %vm536_vm8, %v801_v25, 0.0 }
 0x2ee   : > { %v790_v27 = vadd.f32 %v789_v4, %v788_v24  ;;  %v803_v28 = vrot.slane %v802_v26, 4 }
 0x2f0   : > { %v791_v29 = vrot.slane %v790_v27, 2  ;;  %v804_v5 = vadd.f32 %v803_v28, %v802_v26 }
 0x2f2   : > { %v792_v30 = vadd.f32 %v791_v29, %v790_v27  ;;  %v805_v31 = vrot.slane %v804_v5, 2 }
 0x2f4   : > { %v793_v32 = vrot.slane %v792_v30, 1  ;;  %v806_v33 = vadd.f32 %v805_v31, %v804_v5 }
 0x2f6   : > { %v794_v37 = vadd.f32 %v793_v32, %v792_v30  ;;  %v807_v38 = vrot.slane %v806_v33, 1 }
 0x2f8   : > { %v809_v39 = vmul.f32 0.0009765625, %v794_v37  ;;  %v808_v40 = vadd.f32 %v807_v38, %v806_v33 }
 0x2fa   : > { %v810_v41 = vmul.f32 0.0009765625, %v808_v40  ;;  %v811_v46 = vmul.f32 %v809_v39, %v809_v39  ;;  %v824_v36 = vsub.f32 %v777_v13, %v809_v39  ;;  %v825_v43 = vsub.f32 %v778_v14, %v809_v39 }
 0x2fc   : > { %v812_v47 = vsub.f32 %v810_v41, %v811_v46 }
 0x2fe   : > { %v813_v48 = vadd.f32 1e-05, %v812_v47 }
 0x300   : > { %1110 = vrsqrt.f32 %v813_v48  ;;  %vm820_vm7 = vweird.f32 %v813_v48 }
 0x306   : > { %v1111_v49 = vpop.eup %1110 }
 0x307   : > { %v815_v50 = vmul.f32 %v1111_v49, %v813_v48  ;;  %vm821_vm6 = vweird.f32 %v1111_v49 }
 0x308   : > { %vm822_vm9 = vmor %vm820_vm7, %vm821_vm6 }
 0x309   : > { %v816_v51 = vmul.f32 %v1111_v49, %v815_v50 }
 0x30b   : > { %v817_v52 = vmul.f32 0.5, %v816_v51 }
 0x30d   : > { %v818_v53 = vsub.f32 1.5, %v817_v52 }
 0x30f   : > { %v819_v55 = vmul.f32 %v1111_v49, %v818_v53 }
 0x311   : > { %v823_v56 = vsel %vm822_vm9, %v1111_v49, %v819_v55 }
 0x312   : > { %v826_v57 = vmul.f32 %v823_v56, %v780_v54 }
 0x314   : > { %828 = vst [vmem:[#allocation1] ss:$2 sm:$0xff] %v826_v57 }
 0x31b   : > { %v829_v58 = vld.sshfl [vmem:[#allocation1] sm:$0xff pattern:$0x75316420]  ;;  %v830_v42 = vld.sshfl [vmem:[#allocation1 + $0x8] sm:$0xff pattern:$0x75316420] }
 0x31c   : > { %836 = vst [vmem:[#allocation1] ss:$2 sm:$0xff] %v782_v35  ;;  %v833_v45 = vmul.f32 %v829_v58, %v824_v36  ;;  %v834_v59 = vmul.f32 %v830_v42, %v825_v43 }
 0x323   : > { %v837_v0 = vld.sshfl [vmem:[#allocation1] sm:$0xff pattern:$0x75316420]  ;;  %v838_v60 = vld.sshfl [vmem:[#allocation1 + $0x8] sm:$0xff pattern:$0x75316420] }
 0x324   : > { %v841_v61 = vadd.f32 %v837_v0, %v833_v45  ;;  %v842_v34 = vadd.f32 %v838_v60, %v834_v59 }
 0x326   : > { %v843_v62 = vadd.f32 %v841_v61, %v1428_v15  ;;  %v844_v63 = vadd.f32 %v842_v34, %v1431_v16 }
 0x328   : > { %v845_v2 = vadd.f32 %v843_v62, %v1558_v11  ;;  %v846_v3 = vadd.f32 %v844_v63, %v1560_v7 }
 0x32a   : > { %v848_v9 = vmul.f32 0.5, %v846_v3  ;;  %v847_v10 = vmul.f32 0.5, %v845_v2 }
 0x32c   : > { %v851_v6 = vrot.slane %v848_v9, 4 }
 0x32e   : > { %v852_v15 = vsel %vm536_vm8, %v847_v10, %v851_v6 }
 0x32f   : > { %854 = vst [vmem:[%s267_s17] sm:$0xff] %v852_v15 }
 0x330   : > { %1229 = shalt.err (!%p1226_p8)
}
 0x331   : > { %1005 = dma.vmem_to_hbm [thread:$0]  (%p1357_p5), %s870_s23, 128, %s872_s25, %s856_s22  }
 0x332 PF: > { %p1027_p9 = scmp.ge.s32.totalorder %s1272_s21, 2  ;;  %s883_s8 = sand.u32 1, %s1260_s18  }
 0x333   : > { %s884_s10 = scalar_lea.sflag [#allocation4], %s883_s8 }
 0x334   : > { %p1018_p10 = pnand %p1027_p9, %p1361_p6 }
 0x336   : > { %p1019_p11 = pneg %p1018_p10 }
 0x338   : > { %1255 = dma.done.wait (%p1019_p11), %s884_s10, 128  }
 0x339   : > { %1257 = vsyncadd (%p1019_p11), %s884_s10, 4294967168  ;;  %p17_p12 = scmp.ge.s32.totalorder %s1344_s24, 4   ;;  %s1647_s18 = smov %s1264_s19 }
 0x33a   : > { %s1648_s19 = smov %s1268_s20  ;;  %s1649_s20 = smov %s1355_s27 }
 0x33b   : > { %s1650_s21 = smov %s1344_s24  ;;  %19 = sbr.rel (!%p17_p12) target bundleno = 5 (0x5), region = 96 }
 0x340   :  { %890 = vsyncpa [#allocation3], 1 }
 0x341   :  { %892 = vsyncpa [#allocation3 + $0x1], 1 }
 0x342   :  { %893 = vsyncpa [#allocation6], 1 }
 0x343   :  { %894 = vsyncpa [#allocation4], 1 }
 0x344   :  { %896 = vsyncpa [#allocation4 + $0x1], 1 }

</bundles_post_ra>
